<compile_context>
chip_gen: v6e
topology: v6e:2x2x1
jax: 0.10.0
libtpu: 0.0.40
codegen_flags: <defaults>
</compile_context>

<pallas_src>
import functools

import jax
import jax.numpy as jnp
import numpy as np
from jax.experimental import pallas as pl
from jax.experimental.pallas import tpu as pltpu

EPS = 1e-5
LANE = 128


def _attention_kernel(
    x_ref,        # (1, N, D)      VMEM f32  full sequence row of current batch element
    qkvb_ref,     # (1, 3*inner)   VMEM f32  LN-beta folded into QKV proj (q part pre-scaled)
    rw_ref,       # (H, H)         SMEM f32  re-attention mixing weights
    rln_g_ref,    # (H,)           SMEM f32
    rln_b_ref,    # (H,)           SMEM f32
    bout_ref,     # (1, D)         VMEM f32
    wqkv_ref,     # (D, 3*inner)   VMEM bf16 (LN gamma + q-scale folded in)
    wout_ref,     # (H, Dh, D)     VMEM bf16 head-major view of (H*Dh, D)
    o_ref,        # (1, TQ, D)     VMEM
    qk_scr,       # (N, 2*inner)   VMEM bf16 scratch: [q | k], lane-dense
    vw_scr,       # (H, N, D)      VMEM bf16 scratch: per-head V @ W_out
    *,
    heads,
    dim_head,
    tq,
):
    qt = pl.program_id(1)
    inner = heads * dim_head

    # ---- Stage 1: once per batch row (first query tile) --------------------
    @pl.when(qt == 0)
    def _():
        x = x_ref[0].astype(jnp.float32)                           # (N, D)
        mu = jnp.mean(x, axis=-1, keepdims=True)
        var = jnp.mean((x - mu) ** 2, axis=-1, keepdims=True)
        z = (x - mu) * jax.lax.rsqrt(var + EPS)                    # LN affine folded in W
        qkv = jnp.dot(z.astype(jnp.bfloat16), wqkv_ref[...],
                      preferred_element_type=jnp.float32)          # (N, 3*inner) f32
        qkv = qkv + qkvb_ref[...]                                  # folded LN beta row
        # q (pre-scaled through the weights) and k: one lane-dense bf16 store.
        qk_scr[...] = qkv[:, :2 * inner].astype(jnp.bfloat16)
        # per-head V @ W_out, computed once per row and amortized over q-tiles
        for h in range(heads):
            v_h = qkv[:, 2 * inner + h * dim_head:
                         2 * inner + (h + 1) * dim_head]           # (N, Dh) f32
            vw_scr[h] = jnp.dot(v_h.astype(jnp.bfloat16), wout_ref[h],
                                preferred_element_type=jnp.float32
                                ).astype(jnp.bfloat16)             # (N, D)

    # ---- Stage 2: one query tile against the full key row ------------------
    q0 = pl.multiple_of(qt * tq, tq)

    # per-head scores + softmax (SSA values only; no scratch round trips)
    p = []
    for h in range(heads):
        q_h = qk_scr[pl.ds(q0, tq), h * dim_head:(h + 1) * dim_head]          # (TQ, Dh)
        k_h = qk_scr[:, inner + h * dim_head: inner + (h + 1) * dim_head]     # (N, Dh)
        # q @ k^T: contraction over the last dim of both operands (MXU-native).
        s = jax.lax.dot_general(q_h, k_h, (((1,), (1,)), ((), ())),
                                preferred_element_type=jnp.float32)           # (TQ, N)
        s = s - jnp.max(s, axis=-1, keepdims=True)
        e = jnp.exp(s)
        p.append(e * pl.reciprocal(jnp.sum(e, axis=-1, keepdims=True),
                                   approx=True))
        # Dropout(p=0.0) is the identity.

    # re-attention head mixing + LayerNorm over the head axis, kept in exact f32.
    # The head-sum for the LN mean is accumulated while mixing (single pass);
    # the variance uses the exact (x - mean)^2 form (population stats, eps=1e-5).
    rw = [[rw_ref[h, g] for g in range(heads)] for h in range(heads)]
    inv_heads = 1.0 / heads
    mixed = []
    sum_h = None
    for g in range(heads):
        acc = p[0] * rw[0][g]
        for h in range(1, heads):
            acc = acc + p[h] * rw[h][g]
        mixed.append(acc)                                           # (TQ, N) f32
        sum_h = acc if g == 0 else sum_h + acc
    mean_h = sum_h * inv_heads
    var_h = (mixed[0] - mean_h) ** 2
    for g in range(1, heads):
        var_h = var_h + (mixed[g] - mean_h) ** 2
    inv_std = jax.lax.rsqrt(var_h * inv_heads + EPS)

    # normalized attention feeds straight into  attn_h @ (V_h @ Wout_h)
    # (attn@V and the output projection fused; heads accumulate in f32).
    out = None
    for g in range(heads):
        a_g = ((mixed[g] - mean_h) * inv_std * rln_g_ref[g] + rln_b_ref[g]
               ).astype(jnp.bfloat16)                               # (TQ, N)
        part = jnp.dot(a_g, vw_scr[g], preferred_element_type=jnp.float32)
        out = part if g == 0 else out + part                        # (TQ, D) f32
    out = out + bout_ref[...]
    o_ref[0] = out.astype(o_ref.dtype)


def _round_up(x, m):
    return -(-x // m) * m


def _vmem_usage_bytes(*, N, D, heads, dim_head, tq):
    """Honest per-core VMEM estimate: persistent scratch, double-buffered
    pipeline blocks (lane/sublane padded), and live f32 tile temporaries."""
    inner = heads * dim_head
    f32, bf16 = 4, 2
    qk_scr = _round_up(N, 16) * _round_up(2 * inner, LANE) * bf16
    vw_scr = heads * _round_up(N, 16) * _round_up(D, LANE) * bf16
    x_in = 2 * _round_up(N, 8) * _round_up(D, LANE) * f32
    wqkv = 2 * _round_up(D, 16) * _round_up(3 * inner, LANE) * bf16
    wout = 2 * heads * _round_up(dim_head, 16) * _round_up(D, LANE) * bf16
    vecs = 2 * 8 * (_round_up(3 * inner, LANE) + 2 * _round_up(D, LANE)) * f32
    out = 2 * _round_up(tq, 8) * _round_up(D, LANE) * f32
    live = ((2 * heads + 4) * _round_up(tq, 8) * _round_up(N, LANE)
            + 2 * _round_up(tq, 8) * _round_up(D, LANE)) * f32
    return qk_scr + vw_scr + x_in + wqkv + wout + vecs + out + live


def _pick_tq(N, D, heads, dim_head, budget):
    """Largest query tile that divides N, keeps the output block legal
    ((tq % 8 == 0) or tq == N), and fits the VMEM budget."""
    cands = sorted({d for d in range(1, N + 1)
                    if N % d == 0 and (d % 8 == 0 or d == N)}, reverse=True)
    for tq in cands:
        if _vmem_usage_bytes(N=N, D=D, heads=heads, dim_head=dim_head,
                             tq=tq) <= budget:
            return tq
    return cands[-1]


def attention_pallas(x, params, *, heads, dim_head):
    """x: (B, N, D) float32. Returns (B, N, D)."""
    B, N, D = x.shape
    inner = heads * dim_head
    ln_g, ln_b, wqkv, rw, rln_g, rln_b, wout, bout = params

    # Host-side folding (zero runtime cost):
    #   xn @ Wqkv == standardize(x) @ (gamma[:,None] * Wqkv) + (beta @ Wqkv)
    #   attention scale dim_head**-0.5 folded into the q columns / bias.
    gamma = ln_g.reshape(D).astype(jnp.float32)
    beta = ln_b.reshape(D).astype(jnp.float32)
    scale = dim_head ** -0.5
    col_scale = jnp.concatenate([jnp.full((inner,), scale, jnp.float32),
                                 jnp.ones((2 * inner,), jnp.float32)])
    w_folded = (wqkv.astype(jnp.float32) * gamma[:, None]) * col_scale[None, :]
    qkv_bias = ((beta @ wqkv.astype(jnp.float32)) * col_scale
                ).reshape(1, 3 * inner).astype(jnp.float32)
    wqkv_bf16 = w_folded.astype(jnp.bfloat16)                       # (D, 3*inner)
    wout_hm = wout.reshape(heads, dim_head, D).astype(jnp.bfloat16)  # (H, Dh, D)

    # Device-aware sizing: v7x has 64 MiB VMEM per core, v5e/v6e 128 MiB.
    try:
        info = pltpu.get_tpu_info()
        vmem_cap = int(getattr(info, "vmem_capacity_bytes", 64 * 1024 * 1024))
    except Exception:  # conservative fallback
        vmem_cap = 64 * 1024 * 1024
    vmem_limit = vmem_cap * 3 // 4          # 48 MiB (v7x) / 96 MiB (v5e, v6e)
    tq = _pick_tq(N, D, heads, dim_head, budget=int(vmem_limit * 0.85))
    assert N % tq == 0
    n_q = N // tq

    kernel = functools.partial(_attention_kernel,
                               heads=heads, dim_head=dim_head, tq=tq)

    return pl.pallas_call(
        kernel,
        out_shape=jax.ShapeDtypeStruct((B, N, D), x.dtype),
        grid_spec=pltpu.PrefetchScalarGridSpec(
            num_scalar_prefetch=0,
            grid=(B, n_q),
            in_specs=[
                pl.BlockSpec((1, N, D), lambda b, q: (b, 0, 0)),            # x (full row)
                pl.BlockSpec((1, 3 * inner), lambda b, q: (0, 0)),          # folded qkv bias
                pl.BlockSpec(memory_space=pltpu.MemorySpace.SMEM),          # reattn weights
                pl.BlockSpec(memory_space=pltpu.MemorySpace.SMEM),          # reattn LN gamma
                pl.BlockSpec(memory_space=pltpu.MemorySpace.SMEM),          # reattn LN beta
                pl.BlockSpec((1, D), lambda b, q: (0, 0)),                  # b_out
                pl.BlockSpec((D, 3 * inner), lambda b, q: (0, 0)),          # W_qkv (bf16)
                pl.BlockSpec((heads, dim_head, D), lambda b, q: (0, 0, 0)), # W_out head-major
            ],
            out_specs=pl.BlockSpec((1, tq, D), lambda b, q: (b, q, 0)),
            scratch_shapes=[
                pltpu.VMEM((N, 2 * inner), jnp.bfloat16),   # [q | k] lane-dense slab
                pltpu.VMEM((heads, N, D), jnp.bfloat16),    # per-head V @ W_out
            ],
        ),
        compiler_params=pltpu.CompilerParams(
            # Batch axis "parallel" (megacore); query-tile axis must stay
            # "arbitrary" because scratch is filled at the first tile of a row.
            dimension_semantics=("parallel", "arbitrary"),
            vmem_limit_bytes=int(vmem_limit),
        ),
    )(x, qkv_bias, rw, rln_g, rln_b, bout, wqkv_bf16, wout_hm)


def attention_reference(x, params, *, heads, dim_head):
    """Pure-JAX f32 reference mirroring the PyTorch forward (eval mode)."""
    ln_g, ln_b, wqkv, rw, rln_g, rln_b, wout, bout = params
    B, N, D = x.shape
    inner = heads * dim_head
    scale = dim_head ** -0.5

    mu = jnp.mean(x, axis=-1, keepdims=True)
    var = jnp.mean((x - mu) ** 2, axis=-1, keepdims=True)
    xn = (x - mu) / jnp.sqrt(var + EPS) * ln_g[0] + ln_b[0]

    qkv = xn @ wqkv                                        # (B, N, 3*inner)
    q, k, v = jnp.split(qkv, 3, axis=-1)

    def to_heads(t):
        return t.reshape(B, N, heads, dim_head).transpose(0, 2, 1, 3)  # (B,H,N,Dh)
    q, k, v = map(to_heads, (q, k, v))

    dots = jnp.einsum('bhid,bhjd->bhij', q, k) * scale
    attn = jax.nn.softmax(dots, axis=-1)
    attn = jnp.einsum('bhij,hg->bgij', attn, rw)

    a = attn.transpose(0, 2, 3, 1)                         # (B, N, N, H)
    mu_h = jnp.mean(a, axis=-1, keepdims=True)
    var_h = jnp.mean((a - mu_h) ** 2, axis=-1, keepdims=True)
    a = (a - mu_h) / jnp.sqrt(var_h + EPS) * rln_g + rln_b
    attn = a.transpose(0, 3, 1, 2)                         # (B, H, N, N)

    out = jnp.einsum('bhij,bhjd->bhid', attn, v)
    out = out.transpose(0, 2, 1, 3).reshape(B, N, inner)
    return out @ wout + bout[0]


if __name__ == "__main__":
    # Small shapes consistent with the module: dim=32, heads=4, dim_head=16.
    B, N, D = 2, 8, 32
    heads, dim_head = 4, 16
    inner = heads * dim_head

    key = jax.random.PRNGKey(0)
    kx, kqkv, krw, kwo, kbo = jax.random.split(key, 5)

    x = jax.random.normal(kx, (B, N, D), jnp.float32)

    ln_g = jnp.ones((1, D), jnp.float32)                   # nn.LayerNorm init
    ln_b = jnp.zeros((1, D), jnp.float32)
    wqkv = jax.random.normal(kqkv, (D, 3 * inner), jnp.float32) * 0.05
    rw = jax.random.normal(krw, (heads, heads), jnp.float32)        # torch.randn
    rln_g = jnp.ones((heads,), jnp.float32)
    rln_b = jnp.zeros((heads,), jnp.float32)
    wout = jax.random.normal(kwo, (inner, D), jnp.float32) * 0.05
    bout = jax.random.normal(kbo, (1, D), jnp.float32) * 0.05

    params = (ln_g, ln_b, wqkv, rw, rln_g, rln_b, wout, bout)

    out = attention_pallas(x, params, heads=heads, dim_head=dim_head)
    out = jax.block_until_ready(out)

    ref = attention_reference(x, params, heads=heads, dim_head=dim_head)
    # Tolerance relaxed vs the f32 reference: bf16 MXU operands (f32 accum),
    # approx EUP reciprocal for softmax, and the bf16 V@Wout pre-fold.
    np.testing.assert_allclose(np.asarray(out), np.asarray(ref),
                               rtol=3e-2, atol=3e-2)

    print("KERNEL_OK")
</pallas_src>

<mosaic_0001>
module attributes {stable_mosaic.version = 11 : i64} {
  func.func @_attention_kernel(%arg0: i32, %arg1: i32, %arg2: memref<1x8x32xf32, #tpu.memory_space<vmem>>, %arg3: memref<1x192xf32, #tpu.memory_space<vmem>>, %arg4: memref<4x4xf32, #tpu.memory_space<smem>>, %arg5: memref<4xf32, #tpu.memory_space<smem>>, %arg6: memref<4xf32, #tpu.memory_space<smem>>, %arg7: memref<1x32xf32, #tpu.memory_space<vmem>>, %arg8: memref<32x192xbf16, #tpu.memory_space<vmem>>, %arg9: memref<4x16x32xbf16, #tpu.memory_space<vmem>>, %arg10: memref<1x8x32xf32, #tpu.memory_space<vmem>>, %arg11: memref<8x128xbf16, #tpu.memory_space<vmem>>, %arg12: memref<4x8x32xbf16, #tpu.memory_space<vmem>>) attributes {dimension_semantics = [#tpu.dimension_semantics<parallel>, #tpu.dimension_semantics<arbitrary>], iteration_bounds = array<i64: 2, 1>, scalar_prefetch = 0 : i64, scratch_operands = 2 : i64, tpu.core_type = #tpu.core_type<tc>, window_params = [{transform_indices = @transform_0, window_bounds = array<i64: 1, 8, 32>}, {pipeline_mode = #tpu.pipeline_mode<synchronous>, transform_indices = @transform_1, window_bounds = array<i64: 1, 192>}, {transform_indices = @transform_2, window_bounds = array<i64: 4, 4>}, {transform_indices = @transform_3, window_bounds = array<i64: 4>}, {transform_indices = @transform_4, window_bounds = array<i64: 4>}, {pipeline_mode = #tpu.pipeline_mode<synchronous>, transform_indices = @transform_5, window_bounds = array<i64: 1, 32>}, {pipeline_mode = #tpu.pipeline_mode<synchronous>, transform_indices = @transform_6, window_bounds = array<i64: 32, 192>}, {pipeline_mode = #tpu.pipeline_mode<synchronous>, transform_indices = @transform_7, window_bounds = array<i64: 4, 16, 32>}, {transform_indices = @transform_8, window_bounds = array<i64: 1, 8, 32>}]} {
    %c0_i32 = arith.constant 0 : i32
    %0 = arith.cmpi eq, %arg1, %c0_i32 : i32
    %1 = arith.extui %0 : i1 to i32
    %c0_i32_0 = arith.constant 0 : i32
    %2 = arith.cmpi ne, %1, %c0_i32_0 : i32
    scf.if %2 {
      %c0_77 = arith.constant 0 : index
      %c0_78 = arith.constant 0 : index
      %c0_79 = arith.constant 0 : index
      %199 = vector.load %arg2[%c0_77, %c0_78, %c0_79] : memref<1x8x32xf32, #tpu.memory_space<vmem>>, vector<1x8x32xf32>
      %200 = vector.shape_cast %199 : vector<1x8x32xf32> to vector<8x32xf32>
      %cst_80 = arith.constant dense<0.000000e+00> : vector<8xf32>
      %201 = vector.multi_reduction <add>, %200, %cst_80 [1] : vector<8x32xf32> to vector<8xf32>
      %202 = vector.shape_cast %201 : vector<8xf32> to vector<8x1xf32>
      %cst_81 = arith.constant 3.200000e+01 : f32
      %203 = vector.broadcast %cst_81 : f32 to vector<8x1xf32>
      %204 = arith.divf %202, %203 : vector<8x1xf32>
      %205 = vector.broadcast %204 : vector<8x1xf32> to vector<8x32xf32>
      %206 = arith.subf %200, %205 : vector<8x32xf32>
      %207 = arith.mulf %206, %206 : vector<8x32xf32>
      %cst_82 = arith.constant dense<0.000000e+00> : vector<8xf32>
      %208 = vector.multi_reduction <add>, %207, %cst_82 [1] : vector<8x32xf32> to vector<8xf32>
      %209 = vector.shape_cast %208 : vector<8xf32> to vector<8x1xf32>
      %cst_83 = arith.constant 3.200000e+01 : f32
      %210 = vector.broadcast %cst_83 : f32 to vector<8x1xf32>
      %211 = arith.divf %209, %210 : vector<8x1xf32>
      %212 = vector.broadcast %204 : vector<8x1xf32> to vector<8x32xf32>
      %213 = arith.subf %200, %212 : vector<8x32xf32>
      %cst_84 = arith.constant 9.99999974E-6 : f32
      %214 = vector.broadcast %cst_84 : f32 to vector<8x1xf32>
      %215 = arith.addf %211, %214 : vector<8x1xf32>
      %216 = math.rsqrt %215 : vector<8x1xf32>
      %217 = vector.broadcast %216 : vector<8x1xf32> to vector<8x32xf32>
      %218 = arith.mulf %213, %217 : vector<8x32xf32>
      %219 = arith.truncf %218 : vector<8x32xf32> to vector<8x32xbf16>
      %c0_85 = arith.constant 0 : index
      %c0_86 = arith.constant 0 : index
      %220 = vector.load %arg8[%c0_85, %c0_86] : memref<32x192xbf16, #tpu.memory_space<vmem>>, vector<32x192xbf16>
      %cst_87 = arith.constant dense<0.000000e+00> : vector<8x192xf32>
      %221 = tpu.matmul %219, %220, %cst_87 {dimension_numbers = #tpu.dot_dimension_numbers<[1], [0], [0], [1], [0, 0, 1, 1], [], []>} : vector<8x32xbf16>, vector<32x192xbf16>, vector<8x192xf32> -> vector<8x192xf32>
      %c0_88 = arith.constant 0 : index
      %c0_89 = arith.constant 0 : index
      %222 = vector.load %arg3[%c0_88, %c0_89] : memref<1x192xf32, #tpu.memory_space<vmem>>, vector<1x192xf32>
      %223 = vector.broadcast %222 : vector<1x192xf32> to vector<8x192xf32>
      %224 = arith.addf %221, %223 : vector<8x192xf32>
      %225 = vector.extract_strided_slice %224 {offsets = [0, 0], sizes = [8, 128], strides = [1, 1]} : vector<8x192xf32> to vector<8x128xf32>
      %226 = arith.truncf %225 : vector<8x128xf32> to vector<8x128xbf16>
      %c0_90 = arith.constant 0 : index
      %c0_91 = arith.constant 0 : index
      %227 = vector.load %arg11[%c0_90, %c0_91] : memref<8x128xbf16, #tpu.memory_space<vmem>>, vector<8x128xbf16>
      tpu.vector_store %arg11[%c0_90, %c0_91], %226 {strides = array<i32>} : memref<8x128xbf16, #tpu.memory_space<vmem>>, vector<8x128xbf16>,
      %228 = vector.extract_strided_slice %224 {offsets = [0, 128], sizes = [8, 16], strides = [1, 1]} : vector<8x192xf32> to vector<8x16xf32>
      %229 = arith.truncf %228 : vector<8x16xf32> to vector<8x16xbf16>
      %c0_92 = arith.constant 0 : index
      %c0_93 = arith.constant 0 : index
      %c0_94 = arith.constant 0 : index
      %230 = vector.load %arg9[%c0_92, %c0_93, %c0_94] : memref<4x16x32xbf16, #tpu.memory_space<vmem>>, vector<1x16x32xbf16>
      %231 = vector.shape_cast %230 : vector<1x16x32xbf16> to vector<16x32xbf16>
      %cst_95 = arith.constant dense<0.000000e+00> : vector<8x32xf32>
      %232 = tpu.matmul %229, %231, %cst_95 {dimension_numbers = #tpu.dot_dimension_numbers<[1], [0], [0], [1], [0, 0, 1, 1], [], []>} : vector<8x16xbf16>, vector<16x32xbf16>, vector<8x32xf32> -> vector<8x32xf32>
      %233 = arith.truncf %232 : vector<8x32xf32> to vector<8x32xbf16>
      %c0_96 = arith.constant 0 : index
      %c0_97 = arith.constant 0 : index
      %c0_98 = arith.constant 0 : index
      %234 = vector.load %arg12[%c0_96, %c0_97, %c0_98] : memref<4x8x32xbf16, #tpu.memory_space<vmem>>, vector<1x8x32xbf16>
      %235 = vector.shape_cast %234 : vector<1x8x32xbf16> to vector<8x32xbf16>
      %236 = vector.shape_cast %233 : vector<8x32xbf16> to vector<1x8x32xbf16>
      tpu.vector_store %arg12[%c0_96, %c0_97, %c0_98], %236 {strides = array<i32>} : memref<4x8x32xbf16, #tpu.memory_space<vmem>>, vector<1x8x32xbf16>,
      %237 = vector.extract_strided_slice %224 {offsets = [0, 144], sizes = [8, 16], strides = [1, 1]} : vector<8x192xf32> to vector<8x16xf32>
      %238 = arith.truncf %237 : vector<8x16xf32> to vector<8x16xbf16>
      %c1_99 = arith.constant 1 : index
      %c0_100 = arith.constant 0 : index
      %c0_101 = arith.constant 0 : index
      %239 = vector.load %arg9[%c1_99, %c0_100, %c0_101] : memref<4x16x32xbf16, #tpu.memory_space<vmem>>, vector<1x16x32xbf16>
      %240 = vector.shape_cast %239 : vector<1x16x32xbf16> to vector<16x32xbf16>
      %cst_102 = arith.constant dense<0.000000e+00> : vector<8x32xf32>
      %241 = tpu.matmul %238, %240, %cst_102 {dimension_numbers = #tpu.dot_dimension_numbers<[1], [0], [0], [1], [0, 0, 1, 1], [], []>} : vector<8x16xbf16>, vector<16x32xbf16>, vector<8x32xf32> -> vector<8x32xf32>
      %242 = arith.truncf %241 : vector<8x32xf32> to vector<8x32xbf16>
      %c1_103 = arith.constant 1 : index
      %c0_104 = arith.constant 0 : index
      %c0_105 = arith.constant 0 : index
      %243 = vector.load %arg12[%c1_103, %c0_104, %c0_105] : memref<4x8x32xbf16, #tpu.memory_space<vmem>>, vector<1x8x32xbf16>
      %244 = vector.shape_cast %243 : vector<1x8x32xbf16> to vector<8x32xbf16>
      %245 = vector.shape_cast %242 : vector<8x32xbf16> to vector<1x8x32xbf16>
      tpu.vector_store %arg12[%c1_103, %c0_104, %c0_105], %245 {strides = array<i32>} : memref<4x8x32xbf16, #tpu.memory_space<vmem>>, vector<1x8x32xbf16>,
      %246 = vector.extract_strided_slice %224 {offsets = [0, 160], sizes = [8, 16], strides = [1, 1]} : vector<8x192xf32> to vector<8x16xf32>
      %247 = arith.truncf %246 : vector<8x16xf32> to vector<8x16xbf16>
      %c2_106 = arith.constant 2 : index
      %c0_107 = arith.constant 0 : index
      %c0_108 = arith.constant 0 : index
      %248 = vector.load %arg9[%c2_106, %c0_107, %c0_108] : memref<4x16x32xbf16, #tpu.memory_space<vmem>>, vector<1x16x32xbf16>
      %249 = vector.shape_cast %248 : vector<1x16x32xbf16> to vector<16x32xbf16>
      %cst_109 = arith.constant dense<0.000000e+00> : vector<8x32xf32>
      %250 = tpu.matmul %247, %249, %cst_109 {dimension_numbers = #tpu.dot_dimension_numbers<[1], [0], [0], [1], [0, 0, 1, 1], [], []>} : vector<8x16xbf16>, vector<16x32xbf16>, vector<8x32xf32> -> vector<8x32xf32>
      %251 = arith.truncf %250 : vector<8x32xf32> to vector<8x32xbf16>
      %c2_110 = arith.constant 2 : index
      %c0_111 = arith.constant 0 : index
      %c0_112 = arith.constant 0 : index
      %252 = vector.load %arg12[%c2_110, %c0_111, %c0_112] : memref<4x8x32xbf16, #tpu.memory_space<vmem>>, vector<1x8x32xbf16>
      %253 = vector.shape_cast %252 : vector<1x8x32xbf16> to vector<8x32xbf16>
      %254 = vector.shape_cast %251 : vector<8x32xbf16> to vector<1x8x32xbf16>
      tpu.vector_store %arg12[%c2_110, %c0_111, %c0_112], %254 {strides = array<i32>} : memref<4x8x32xbf16, #tpu.memory_space<vmem>>, vector<1x8x32xbf16>,
      %255 = vector.extract_strided_slice %224 {offsets = [0, 176], sizes = [8, 16], strides = [1, 1]} : vector<8x192xf32> to vector<8x16xf32>
      %256 = arith.truncf %255 : vector<8x16xf32> to vector<8x16xbf16>
      %c3_113 = arith.constant 3 : index
      %c0_114 = arith.constant 0 : index
      %c0_115 = arith.constant 0 : index
      %257 = vector.load %arg9[%c3_113, %c0_114, %c0_115] : memref<4x16x32xbf16, #tpu.memory_space<vmem>>, vector<1x16x32xbf16>
      %258 = vector.shape_cast %257 : vector<1x16x32xbf16> to vector<16x32xbf16>
      %cst_116 = arith.constant dense<0.000000e+00> : vector<8x32xf32>
      %259 = tpu.matmul %256, %258, %cst_116 {dimension_numbers = #tpu.dot_dimension_numbers<[1], [0], [0], [1], [0, 0, 1, 1], [], []>} : vector<8x16xbf16>, vector<16x32xbf16>, vector<8x32xf32> -> vector<8x32xf32>
      %260 = arith.truncf %259 : vector<8x32xf32> to vector<8x32xbf16>
      %c3_117 = arith.constant 3 : index
      %c0_118 = arith.constant 0 : index
      %c0_119 = arith.constant 0 : index
      %261 = vector.load %arg12[%c3_117, %c0_118, %c0_119] : memref<4x8x32xbf16, #tpu.memory_space<vmem>>, vector<1x8x32xbf16>
      %262 = vector.shape_cast %261 : vector<1x8x32xbf16> to vector<8x32xbf16>
      %263 = vector.shape_cast %260 : vector<8x32xbf16> to vector<1x8x32xbf16>
      tpu.vector_store %arg12[%c3_117, %c0_118, %c0_119], %263 {strides = array<i32>} : memref<4x8x32xbf16, #tpu.memory_space<vmem>>, vector<1x8x32xbf16>,
    } else {
    }
    %c8_i32 = arith.constant 8 : i32
    %3 = arith.muli %arg1, %c8_i32 : i32
    %4 = tpu.assume_multiple %3, 8 : i32
    %5 = arith.index_cast %4 : i32 to index
    %c0 = arith.constant 0 : index
    %6 = vector.load %arg11[%5, %c0] : memref<8x128xbf16, #tpu.memory_space<vmem>>, vector<8x16xbf16>
    %c0_1 = arith.constant 0 : index
    %c64 = arith.constant 64 : index
    %7 = vector.load %arg11[%c0_1, %c64] : memref<8x128xbf16, #tpu.memory_space<vmem>>, vector<8x16xbf16>
    %cst = arith.constant dense<0.000000e+00> : vector<8x8xf32>
    %8 = tpu.matmul %6, %7, %cst {dimension_numbers = #tpu.dot_dimension_numbers<[1], [1], [0], [0], [0, 0, 1, 0], [], []>} : vector<8x16xbf16>, vector<8x16xbf16>, vector<8x8xf32> -> vector<8x8xf32>
    %cst_2 = arith.constant dense<0xFF800000> : vector<8xf32>
    %9 = vector.multi_reduction <maximumf>, %8, %cst_2 [1] : vector<8x8xf32> to vector<8xf32>
    %10 = vector.shape_cast %9 : vector<8xf32> to vector<8x1xf32>
    %11 = vector.broadcast %10 : vector<8x1xf32> to vector<8x8xf32>
    %12 = arith.subf %8, %11 : vector<8x8xf32>
    %13 = math.exp %12 : vector<8x8xf32>
    %cst_3 = arith.constant dense<0.000000e+00> : vector<8xf32>
    %14 = vector.multi_reduction <add>, %13, %cst_3 [1] : vector<8x8xf32> to vector<8xf32>
    %15 = vector.shape_cast %14 : vector<8xf32> to vector<8x1xf32>
    %16 = tpu.reciprocal %15 {approx = true} : vector<8x1xf32> -> vector<8x1xf32>
    %17 = vector.broadcast %16 : vector<8x1xf32> to vector<8x8xf32>
    %18 = arith.mulf %13, %17 : vector<8x8xf32>
    %19 = arith.index_cast %4 : i32 to index
    %c16 = arith.constant 16 : index
    %20 = vector.load %arg11[%19, %c16] : memref<8x128xbf16, #tpu.memory_space<vmem>>, vector<8x16xbf16>
    %c0_4 = arith.constant 0 : index
    %c80 = arith.constant 80 : index
    %21 = vector.load %arg11[%c0_4, %c80] : memref<8x128xbf16, #tpu.memory_space<vmem>>, vector<8x16xbf16>
    %cst_5 = arith.constant dense<0.000000e+00> : vector<8x8xf32>
    %22 = tpu.matmul %20, %21, %cst_5 {dimension_numbers = #tpu.dot_dimension_numbers<[1], [1], [0], [0], [0, 0, 1, 0], [], []>} : vector<8x16xbf16>, vector<8x16xbf16>, vector<8x8xf32> -> vector<8x8xf32>
    %cst_6 = arith.constant dense<0xFF800000> : vector<8xf32>
    %23 = vector.multi_reduction <maximumf>, %22, %cst_6 [1] : vector<8x8xf32> to vector<8xf32>
    %24 = vector.shape_cast %23 : vector<8xf32> to vector<8x1xf32>
    %25 = vector.broadcast %24 : vector<8x1xf32> to vector<8x8xf32>
    %26 = arith.subf %22, %25 : vector<8x8xf32>
    %27 = math.exp %26 : vector<8x8xf32>
    %cst_7 = arith.constant dense<0.000000e+00> : vector<8xf32>
    %28 = vector.multi_reduction <add>, %27, %cst_7 [1] : vector<8x8xf32> to vector<8xf32>
    %29 = vector.shape_cast %28 : vector<8xf32> to vector<8x1xf32>
    %30 = tpu.reciprocal %29 {approx = true} : vector<8x1xf32> -> vector<8x1xf32>
    %31 = vector.broadcast %30 : vector<8x1xf32> to vector<8x8xf32>
    %32 = arith.mulf %27, %31 : vector<8x8xf32>
    %33 = arith.index_cast %4 : i32 to index
    %c32 = arith.constant 32 : index
    %34 = vector.load %arg11[%33, %c32] : memref<8x128xbf16, #tpu.memory_space<vmem>>, vector<8x16xbf16>
    %c0_8 = arith.constant 0 : index
    %c96 = arith.constant 96 : index
    %35 = vector.load %arg11[%c0_8, %c96] : memref<8x128xbf16, #tpu.memory_space<vmem>>, vector<8x16xbf16>
    %cst_9 = arith.constant dense<0.000000e+00> : vector<8x8xf32>
    %36 = tpu.matmul %34, %35, %cst_9 {dimension_numbers = #tpu.dot_dimension_numbers<[1], [1], [0], [0], [0, 0, 1, 0], [], []>} : vector<8x16xbf16>, vector<8x16xbf16>, vector<8x8xf32> -> vector<8x8xf32>
    %cst_10 = arith.constant dense<0xFF800000> : vector<8xf32>
    %37 = vector.multi_reduction <maximumf>, %36, %cst_10 [1] : vector<8x8xf32> to vector<8xf32>
    %38 = vector.shape_cast %37 : vector<8xf32> to vector<8x1xf32>
    %39 = vector.broadcast %38 : vector<8x1xf32> to vector<8x8xf32>
    %40 = arith.subf %36, %39 : vector<8x8xf32>
    %41 = math.exp %40 : vector<8x8xf32>
    %cst_11 = arith.constant dense<0.000000e+00> : vector<8xf32>
    %42 = vector.multi_reduction <add>, %41, %cst_11 [1] : vector<8x8xf32> to vector<8xf32>
    %43 = vector.shape_cast %42 : vector<8xf32> to vector<8x1xf32>
    %44 = tpu.reciprocal %43 {approx = true} : vector<8x1xf32> -> vector<8x1xf32>
    %45 = vector.broadcast %44 : vector<8x1xf32> to vector<8x8xf32>
    %46 = arith.mulf %41, %45 : vector<8x8xf32>
    %47 = arith.index_cast %4 : i32 to index
    %c48 = arith.constant 48 : index
    %48 = vector.load %arg11[%47, %c48] : memref<8x128xbf16, #tpu.memory_space<vmem>>, vector<8x16xbf16>
    %c0_12 = arith.constant 0 : index
    %c112 = arith.constant 112 : index
    %49 = vector.load %arg11[%c0_12, %c112] : memref<8x128xbf16, #tpu.memory_space<vmem>>, vector<8x16xbf16>
    %cst_13 = arith.constant dense<0.000000e+00> : vector<8x8xf32>
    %50 = tpu.matmul %48, %49, %cst_13 {dimension_numbers = #tpu.dot_dimension_numbers<[1], [1], [0], [0], [0, 0, 1, 0], [], []>} : vector<8x16xbf16>, vector<8x16xbf16>, vector<8x8xf32> -> vector<8x8xf32>
    %cst_14 = arith.constant dense<0xFF800000> : vector<8xf32>
    %51 = vector.multi_reduction <maximumf>, %50, %cst_14 [1] : vector<8x8xf32> to vector<8xf32>
    %52 = vector.shape_cast %51 : vector<8xf32> to vector<8x1xf32>
    %53 = vector.broadcast %52 : vector<8x1xf32> to vector<8x8xf32>
    %54 = arith.subf %50, %53 : vector<8x8xf32>
    %55 = math.exp %54 : vector<8x8xf32>
    %cst_15 = arith.constant dense<0.000000e+00> : vector<8xf32>
    %56 = vector.multi_reduction <add>, %55, %cst_15 [1] : vector<8x8xf32> to vector<8xf32>
    %57 = vector.shape_cast %56 : vector<8xf32> to vector<8x1xf32>
    %58 = tpu.reciprocal %57 {approx = true} : vector<8x1xf32> -> vector<8x1xf32>
    %59 = vector.broadcast %58 : vector<8x1xf32> to vector<8x8xf32>
    %60 = arith.mulf %55, %59 : vector<8x8xf32>
    %c0_16 = arith.constant 0 : index
    %c0_17 = arith.constant 0 : index
    %61 = memref.load %arg4[%c0_16, %c0_17] : memref<4x4xf32, #tpu.memory_space<smem>>
    %c0_18 = arith.constant 0 : index
    %c1 = arith.constant 1 : index
    %62 = memref.load %arg4[%c0_18, %c1] : memref<4x4xf32, #tpu.memory_space<smem>>
    %c0_19 = arith.constant 0 : index
    %c2 = arith.constant 2 : index
    %63 = memref.load %arg4[%c0_19, %c2] : memref<4x4xf32, #tpu.memory_space<smem>>
    %c0_20 = arith.constant 0 : index
    %c3 = arith.constant 3 : index
    %64 = memref.load %arg4[%c0_20, %c3] : memref<4x4xf32, #tpu.memory_space<smem>>
    %c1_21 = arith.constant 1 : index
    %c0_22 = arith.constant 0 : index
    %65 = memref.load %arg4[%c1_21, %c0_22] : memref<4x4xf32, #tpu.memory_space<smem>>
    %c1_23 = arith.constant 1 : index
    %c1_24 = arith.constant 1 : index
    %66 = memref.load %arg4[%c1_23, %c1_24] : memref<4x4xf32, #tpu.memory_space<smem>>
    %c1_25 = arith.constant 1 : index
    %c2_26 = arith.constant 2 : index
    %67 = memref.load %arg4[%c1_25, %c2_26] : memref<4x4xf32, #tpu.memory_space<smem>>
    %c1_27 = arith.constant 1 : index
    %c3_28 = arith.constant 3 : index
    %68 = memref.load %arg4[%c1_27, %c3_28] : memref<4x4xf32, #tpu.memory_space<smem>>
    %c2_29 = arith.constant 2 : index
    %c0_30 = arith.constant 0 : index
    %69 = memref.load %arg4[%c2_29, %c0_30] : memref<4x4xf32, #tpu.memory_space<smem>>
    %c2_31 = arith.constant 2 : index
    %c1_32 = arith.constant 1 : index
    %70 = memref.load %arg4[%c2_31, %c1_32] : memref<4x4xf32, #tpu.memory_space<smem>>
    %c2_33 = arith.constant 2 : index
    %c2_34 = arith.constant 2 : index
    %71 = memref.load %arg4[%c2_33, %c2_34] : memref<4x4xf32, #tpu.memory_space<smem>>
    %c2_35 = arith.constant 2 : index
    %c3_36 = arith.constant 3 : index
    %72 = memref.load %arg4[%c2_35, %c3_36] : memref<4x4xf32, #tpu.memory_space<smem>>
    %c3_37 = arith.constant 3 : index
    %c0_38 = arith.constant 0 : index
    %73 = memref.load %arg4[%c3_37, %c0_38] : memref<4x4xf32, #tpu.memory_space<smem>>
    %c3_39 = arith.constant 3 : index
    %c1_40 = arith.constant 1 : index
    %74 = memref.load %arg4[%c3_39, %c1_40] : memref<4x4xf32, #tpu.memory_space<smem>>
    %c3_41 = arith.constant 3 : index
    %c2_42 = arith.constant 2 : index
    %75 = memref.load %arg4[%c3_41, %c2_42] : memref<4x4xf32, #tpu.memory_space<smem>>
    %c3_43 = arith.constant 3 : index
    %c3_44 = arith.constant 3 : index
    %76 = memref.load %arg4[%c3_43, %c3_44] : memref<4x4xf32, #tpu.memory_space<smem>>
    %77 = vector.broadcast %61 : f32 to vector<8x8xf32>
    %78 = arith.mulf %18, %77 : vector<8x8xf32>
    %79 = vector.broadcast %65 : f32 to vector<8x8xf32>
    %80 = arith.mulf %32, %79 : vector<8x8xf32>
    %81 = arith.addf %78, %80 : vector<8x8xf32>
    %82 = vector.broadcast %69 : f32 to vector<8x8xf32>
    %83 = arith.mulf %46, %82 : vector<8x8xf32>
    %84 = arith.addf %81, %83 : vector<8x8xf32>
    %85 = vector.broadcast %73 : f32 to vector<8x8xf32>
    %86 = arith.mulf %60, %85 : vector<8x8xf32>
    %87 = arith.addf %84, %86 : vector<8x8xf32>
    %88 = vector.broadcast %62 : f32 to vector<8x8xf32>
    %89 = arith.mulf %18, %88 : vector<8x8xf32>
    %90 = vector.broadcast %66 : f32 to vector<8x8xf32>
    %91 = arith.mulf %32, %90 : vector<8x8xf32>
    %92 = arith.addf %89, %91 : vector<8x8xf32>
    %93 = vector.broadcast %70 : f32 to vector<8x8xf32>
    %94 = arith.mulf %46, %93 : vector<8x8xf32>
    %95 = arith.addf %92, %94 : vector<8x8xf32>
    %96 = vector.broadcast %74 : f32 to vector<8x8xf32>
    %97 = arith.mulf %60, %96 : vector<8x8xf32>
    %98 = arith.addf %95, %97 : vector<8x8xf32>
    %99 = arith.addf %87, %98 : vector<8x8xf32>
    %100 = vector.broadcast %63 : f32 to vector<8x8xf32>
    %101 = arith.mulf %18, %100 : vector<8x8xf32>
    %102 = vector.broadcast %67 : f32 to vector<8x8xf32>
    %103 = arith.mulf %32, %102 : vector<8x8xf32>
    %104 = arith.addf %101, %103 : vector<8x8xf32>
    %105 = vector.broadcast %71 : f32 to vector<8x8xf32>
    %106 = arith.mulf %46, %105 : vector<8x8xf32>
    %107 = arith.addf %104, %106 : vector<8x8xf32>
    %108 = vector.broadcast %75 : f32 to vector<8x8xf32>
    %109 = arith.mulf %60, %108 : vector<8x8xf32>
    %110 = arith.addf %107, %109 : vector<8x8xf32>
    %111 = arith.addf %99, %110 : vector<8x8xf32>
    %112 = vector.broadcast %64 : f32 to vector<8x8xf32>
    %113 = arith.mulf %18, %112 : vector<8x8xf32>
    %114 = vector.broadcast %68 : f32 to vector<8x8xf32>
    %115 = arith.mulf %32, %114 : vector<8x8xf32>
    %116 = arith.addf %113, %115 : vector<8x8xf32>
    %117 = vector.broadcast %72 : f32 to vector<8x8xf32>
    %118 = arith.mulf %46, %117 : vector<8x8xf32>
    %119 = arith.addf %116, %118 : vector<8x8xf32>
    %120 = vector.broadcast %76 : f32 to vector<8x8xf32>
    %121 = arith.mulf %60, %120 : vector<8x8xf32>
    %122 = arith.addf %119, %121 : vector<8x8xf32>
    %123 = arith.addf %111, %122 : vector<8x8xf32>
    %cst_45 = arith.constant 2.500000e-01 : f32
    %124 = vector.broadcast %cst_45 : f32 to vector<8x8xf32>
    %125 = arith.mulf %123, %124 : vector<8x8xf32>
    %126 = arith.subf %87, %125 : vector<8x8xf32>
    %127 = arith.mulf %126, %126 : vector<8x8xf32>
    %128 = arith.subf %98, %125 : vector<8x8xf32>
    %129 = arith.mulf %128, %128 : vector<8x8xf32>
    %130 = arith.addf %127, %129 : vector<8x8xf32>
    %131 = arith.subf %110, %125 : vector<8x8xf32>
    %132 = arith.mulf %131, %131 : vector<8x8xf32>
    %133 = arith.addf %130, %132 : vector<8x8xf32>
    %134 = arith.subf %122, %125 : vector<8x8xf32>
    %135 = arith.mulf %134, %134 : vector<8x8xf32>
    %136 = arith.addf %133, %135 : vector<8x8xf32>
    %cst_46 = arith.constant 2.500000e-01 : f32
    %137 = vector.broadcast %cst_46 : f32 to vector<8x8xf32>
    %138 = arith.mulf %136, %137 : vector<8x8xf32>
    %cst_47 = arith.constant 9.99999974E-6 : f32
    %139 = vector.broadcast %cst_47 : f32 to vector<8x8xf32>
    %140 = arith.addf %138, %139 : vector<8x8xf32>
    %141 = math.rsqrt %140 : vector<8x8xf32>
    %142 = arith.subf %87, %125 : vector<8x8xf32>
    %143 = arith.mulf %142, %141 : vector<8x8xf32>
    %c0_48 = arith.constant 0 : index
    %144 = memref.load %arg5[%c0_48] : memref<4xf32, #tpu.memory_space<smem>>
    %145 = vector.broadcast %144 : f32 to vector<8x8xf32>
    %146 = arith.mulf %143, %145 : vector<8x8xf32>
    %c0_49 = arith.constant 0 : index
    %147 = memref.load %arg6[%c0_49] : memref<4xf32, #tpu.memory_space<smem>>
    %148 = vector.broadcast %147 : f32 to vector<8x8xf32>
    %149 = arith.addf %146, %148 : vector<8x8xf32>
    %150 = arith.truncf %149 : vector<8x8xf32> to vector<8x8xbf16>
    %c0_50 = arith.constant 0 : index
    %c0_51 = arith.constant 0 : index
    %c0_52 = arith.constant 0 : index
    %151 = vector.load %arg12[%c0_50, %c0_51, %c0_52] : memref<4x8x32xbf16, #tpu.memory_space<vmem>>, vector<1x8x32xbf16>
    %152 = vector.shape_cast %151 : vector<1x8x32xbf16> to vector<8x32xbf16>
    %cst_53 = arith.constant dense<0.000000e+00> : vector<8x32xf32>
    %153 = tpu.matmul %150, %152, %cst_53 {dimension_numbers = #tpu.dot_dimension_numbers<[1], [0], [0], [1], [0, 0, 1, 1], [], []>} : vector<8x8xbf16>, vector<8x32xbf16>, vector<8x32xf32> -> vector<8x32xf32>
    %154 = arith.subf %98, %125 : vector<8x8xf32>
    %155 = arith.mulf %154, %141 : vector<8x8xf32>
    %c1_54 = arith.constant 1 : index
    %156 = memref.load %arg5[%c1_54] : memref<4xf32, #tpu.memory_space<smem>>
    %157 = vector.broadcast %156 : f32 to vector<8x8xf32>
    %158 = arith.mulf %155, %157 : vector<8x8xf32>
    %c1_55 = arith.constant 1 : index
    %159 = memref.load %arg6[%c1_55] : memref<4xf32, #tpu.memory_space<smem>>
    %160 = vector.broadcast %159 : f32 to vector<8x8xf32>
    %161 = arith.addf %158, %160 : vector<8x8xf32>
    %162 = arith.truncf %161 : vector<8x8xf32> to vector<8x8xbf16>
    %c1_56 = arith.constant 1 : index
    %c0_57 = arith.constant 0 : index
    %c0_58 = arith.constant 0 : index
    %163 = vector.load %arg12[%c1_56, %c0_57, %c0_58] : memref<4x8x32xbf16, #tpu.memory_space<vmem>>, vector<1x8x32xbf16>
    %164 = vector.shape_cast %163 : vector<1x8x32xbf16> to vector<8x32xbf16>
    %cst_59 = arith.constant dense<0.000000e+00> : vector<8x32xf32>
    %165 = tpu.matmul %162, %164, %cst_59 {dimension_numbers = #tpu.dot_dimension_numbers<[1], [0], [0], [1], [0, 0, 1, 1], [], []>} : vector<8x8xbf16>, vector<8x32xbf16>, vector<8x32xf32> -> vector<8x32xf32>
    %166 = arith.addf %153, %165 : vector<8x32xf32>
    %167 = arith.subf %110, %125 : vector<8x8xf32>
    %168 = arith.mulf %167, %141 : vector<8x8xf32>
    %c2_60 = arith.constant 2 : index
    %169 = memref.load %arg5[%c2_60] : memref<4xf32, #tpu.memory_space<smem>>
    %170 = vector.broadcast %169 : f32 to vector<8x8xf32>
    %171 = arith.mulf %168, %170 : vector<8x8xf32>
    %c2_61 = arith.constant 2 : index
    %172 = memref.load %arg6[%c2_61] : memref<4xf32, #tpu.memory_space<smem>>
    %173 = vector.broadcast %172 : f32 to vector<8x8xf32>
    %174 = arith.addf %171, %173 : vector<8x8xf32>
    %175 = arith.truncf %174 : vector<8x8xf32> to vector<8x8xbf16>
    %c2_62 = arith.constant 2 : index
    %c0_63 = arith.constant 0 : index
    %c0_64 = arith.constant 0 : index
    %176 = vector.load %arg12[%c2_62, %c0_63, %c0_64] : memref<4x8x32xbf16, #tpu.memory_space<vmem>>, vector<1x8x32xbf16>
    %177 = vector.shape_cast %176 : vector<1x8x32xbf16> to vector<8x32xbf16>
    %cst_65 = arith.constant dense<0.000000e+00> : vector<8x32xf32>
    %178 = tpu.matmul %175, %177, %cst_65 {dimension_numbers = #tpu.dot_dimension_numbers<[1], [0], [0], [1], [0, 0, 1, 1], [], []>} : vector<8x8xbf16>, vector<8x32xbf16>, vector<8x32xf32> -> vector<8x32xf32>
    %179 = arith.addf %166, %178 : vector<8x32xf32>
    %180 = arith.subf %122, %125 : vector<8x8xf32>
    %181 = arith.mulf %180, %141 : vector<8x8xf32>
    %c3_66 = arith.constant 3 : index
    %182 = memref.load %arg5[%c3_66] : memref<4xf32, #tpu.memory_space<smem>>
    %183 = vector.broadcast %182 : f32 to vector<8x8xf32>
    %184 = arith.mulf %181, %183 : vector<8x8xf32>
    %c3_67 = arith.constant 3 : index
    %185 = memref.load %arg6[%c3_67] : memref<4xf32, #tpu.memory_space<smem>>
    %186 = vector.broadcast %185 : f32 to vector<8x8xf32>
    %187 = arith.addf %184, %186 : vector<8x8xf32>
    %188 = arith.truncf %187 : vector<8x8xf32> to vector<8x8xbf16>
    %c3_68 = arith.constant 3 : index
    %c0_69 = arith.constant 0 : index
    %c0_70 = arith.constant 0 : index
    %189 = vector.load %arg12[%c3_68, %c0_69, %c0_70] : memref<4x8x32xbf16, #tpu.memory_space<vmem>>, vector<1x8x32xbf16>
    %190 = vector.shape_cast %189 : vector<1x8x32xbf16> to vector<8x32xbf16>
    %cst_71 = arith.constant dense<0.000000e+00> : vector<8x32xf32>
    %191 = tpu.matmul %188, %190, %cst_71 {dimension_numbers = #tpu.dot_dimension_numbers<[1], [0], [0], [1], [0, 0, 1, 1], [], []>} : vector<8x8xbf16>, vector<8x32xbf16>, vector<8x32xf32> -> vector<8x32xf32>
    %192 = arith.addf %179, %191 : vector<8x32xf32>
    %c0_72 = arith.constant 0 : index
    %c0_73 = arith.constant 0 : index
    %193 = vector.load %arg7[%c0_72, %c0_73] : memref<1x32xf32, #tpu.memory_space<vmem>>, vector<1x32xf32>
    %194 = vector.broadcast %193 : vector<1x32xf32> to vector<8x32xf32>
    %195 = arith.addf %192, %194 : vector<8x32xf32>
    %c0_74 = arith.constant 0 : index
    %c0_75 = arith.constant 0 : index
    %c0_76 = arith.constant 0 : index
    %196 = vector.load %arg10[%c0_74, %c0_75, %c0_76] : memref<1x8x32xf32, #tpu.memory_space<vmem>>, vector<1x8x32xf32>
    %197 = vector.shape_cast %196 : vector<1x8x32xf32> to vector<8x32xf32>
    %198 = vector.shape_cast %195 : vector<8x32xf32> to vector<1x8x32xf32>
    tpu.vector_store %arg10[%c0_74, %c0_75, %c0_76], %198 {strides = array<i32>} : memref<1x8x32xf32, #tpu.memory_space<vmem>>, vector<1x8x32xf32>,
    return
  }
  func.func @transform_0(%arg0: i32, %arg1: i32) -> (i32, i32, i32) {
    %c0_i32 = arith.constant 0 : i32
    %c0_i32_0 = arith.constant 0 : i32
    %c0_i32_1 = arith.constant 0 : i32
    return %arg0, %c0_i32, %c0_i32_0 : i32, i32, i32
  }
  func.func @transform_1(%arg0: i32, %arg1: i32) -> (i32, i32) {
    %c0_i32 = arith.constant 0 : i32
    %c0_i32_0 = arith.constant 0 : i32
    %c0_i32_1 = arith.constant 0 : i32
    return %c0_i32, %c0_i32_0 : i32, i32
  }
  func.func @transform_2(%arg0: i32, %arg1: i32) -> (i32, i32) {
    %c0_i32 = arith.constant 0 : i32
    %c0_i32_0 = arith.constant 0 : i32
    %c0_i32_1 = arith.constant 0 : i32
    return %c0_i32, %c0_i32_0 : i32, i32
  }
  func.func @transform_3(%arg0: i32, %arg1: i32) -> i32 {
    %c0_i32 = arith.constant 0 : i32
    %c0_i32_0 = arith.constant 0 : i32
    return %c0_i32 : i32
  }
  func.func @transform_4(%arg0: i32, %arg1: i32) -> i32 {
    %c0_i32 = arith.constant 0 : i32
    %c0_i32_0 = arith.constant 0 : i32
    return %c0_i32 : i32
  }
  func.func @transform_5(%arg0: i32, %arg1: i32) -> (i32, i32) {
    %c0_i32 = arith.constant 0 : i32
    %c0_i32_0 = arith.constant 0 : i32
    %c0_i32_1 = arith.constant 0 : i32
    return %c0_i32, %c0_i32_0 : i32, i32
  }
  func.func @transform_6(%arg0: i32, %arg1: i32) -> (i32, i32) {
    %c0_i32 = arith.constant 0 : i32
    %c0_i32_0 = arith.constant 0 : i32
    %c0_i32_1 = arith.constant 0 : i32
    return %c0_i32, %c0_i32_0 : i32, i32
  }
  func.func @transform_7(%arg0: i32, %arg1: i32) -> (i32, i32, i32) {
    %c0_i32 = arith.constant 0 : i32
    %c0_i32_0 = arith.constant 0 : i32
    %c0_i32_1 = arith.constant 0 : i32
    %c0_i32_2 = arith.constant 0 : i32
    return %c0_i32, %c0_i32_0, %c0_i32_1 : i32, i32, i32
  }
  func.func @transform_8(%arg0: i32, %arg1: i32) -> (i32, i32, i32) {
    %c0_i32 = arith.constant 0 : i32
    %c0_i32_0 = arith.constant 0 : i32
    return %arg0, %arg1, %c0_i32 : i32, i32, i32
  }
}

</mosaic_0001>

<bundles_post_ra>
// kernel: tpu_custom_call.1
= control target key start
LH: loop header
LB: loop body
LE: loop exit
PB: predicated region body
PF: predicated region fallthrough
CT: control target
= control target key end

     0   :  { %s2502_s0 = inlined_call_operand.hbm [shape: f32[2,8,32], index: 0, kind: input, shape index: {}]   ;;  %s2503_s1 = inlined_call_operand.hbm [shape: f32[1,192], index: 1, kind: input, shape index: {}]   ;;  %s2504_s2 = inlined_call_operand.hbm [shape: f32[4,4], index: 2, kind: input, shape index: {}]   ;;  %s2505_s3 = inlined_call_operand.vmem [shape: f32[4], index: 3, kind: input, shape index: {}]   ;;  %s2506_s4 = inlined_call_operand.vmem [shape: f32[4], index: 4, kind: input, shape index: {}]   ;;  %s2507_s5 = inlined_call_operand.vmem [shape: f32[1,32], index: 5, kind: input, shape index: {}]   ;;  %s2508_s6 = inlined_call_operand.hbm [shape: bf16[32,192], index: 6, kind: input, shape index: {}]   ;;  %s2509_s7 = inlined_call_operand.hbm [shape: bf16[4,16,32], index: 7, kind: input, shape index: {}]   ;;  %s2510_s8 = inlined_call_operand.hbm [shape: f32[2,8,32], index: 8, kind: output, shape index: {}]  }
   0x1   :  { %2513 = sst [smem:[#allocation27_spill]] %s2503_s1 }
   0x2   :  { %2514 = sst [smem:[#allocation28_spill]] %s2504_s2 }
   0x3   :  { %2515 = sst [smem:[#allocation29_spill]] %s2505_s3 }
   0x4   :  { %2516 = sst [smem:[#allocation30_spill]] %s2506_s4 }
   0x5   :  { %2517 = sst [smem:[#allocation31_spill]] %s2508_s6 }
   0x6   :  { %13 = vsyncpa [#allocation5], 0 }
   0x7   :  { %15 = vsyncpa [#allocation5 + $0x1], 0 }
   0x8   :  { %16 = vsyncpa [#allocation10], 0 }
   0x9   :  { %17 = vsyncpa [#allocation7], 0 }
   0xa   :  { %18 = vsyncpa [#allocation8], 0 }
   0xb   :  { %19 = vsyncpa [#allocation14], 0 }
   0xc   :  { %20 = vsyncpa [#allocation17], 0 }
   0xd   :  { %21 = vsyncpa [#allocation6], 0 }
   0xe   :  { %23 = vsyncpa [#allocation6 + $0x1], 0  ;;  %s2132_s27 = smov 0   ;;  %s2134_s28 = smov 0  }
   0xf   :  { %s2136_s29 = smov 0   ;;  %s2138_s30 = smov 0  }
  0x10   :  { %s2140_s9 = smov 0   ;;  %s2142_s10 = smov 0  }
  0x11 LB: > { %s1477_s11 = sadd.s32 4294967295, %s2063_s10   ;;  %p1479_p0 = scmp.ge.s32.totalorder %s2063_s10, 1  ;;  %s2063_s10 = sphi %s2142_s10, %s29_s10   ;;  %s2059_s9 = sphi %s2140_s9, %s2539_s9   ;;  %s2055_s30 = sphi %s2138_s30, %s2538_s30   ;;  %s2051_s29 = sphi %s2136_s29, %s2537_s29   ;;  %s2047_s28 = sphi %s2134_s28, %s2536_s28   ;;  %s2043_s27 = sphi %s2132_s27, %s2535_s27  }
  0x12   : > { %p2166_p1 = scmp.eq.s32.totalorder %s1477_s11, 0  ;;  %p247_p2 = scmp.lt.s32.totalorder %s2063_s10, 3 }
  0x13   : > { %s2065_s14 = smov [#allocation9]   ;;  %s2520_s3 = sld [smem:[#allocation29_spill]] }
  0x14   : > { %p2171_p3 = pnand %p1479_p0, %p247_p2  ;;  %s260_s15 = sshll.u32 %s2065_s14, 4  ;;  %s261_s15 = int_to_ptr.vmem [resolvable:$true] %s260_s15 }
  0x15   : > { %s2522_s4 = sld [smem:[#allocation30_spill]]  ;;  %s1823_s24 = scalar_lea.vmem %s261_s15, 32 }
  0x16   : > { %s2519_s13 = scalar_select %p2171_p3, 1, 0 }
  0x17   : > { %p1671_p5 = pneg %p2171_p3  ;;  %p1824_p8 = scmp.ne.s32.totalorder %s261_s15, %s1823_s24 }
  0x18   : > { %p1831_p11 = scmp.lt.s32.totalorder %s261_s15, %s261_s15  ;;  %p1832_p12 = scmp.lt.s32.totalorder %s1823_s24, %s1823_s24 }
  0x19   : > { %s280_s18 = sshll.u32 %s2520_s3, 4  ;;  %p2183_p6 = pnand %p1671_p5, %p2166_p1  ;;  %s281_s18 = int_to_ptr.vmem [resolvable:$true] %s280_s18 }
  0x1a   : > { %p1833_p13 = por %p1832_p12, %p1831_p11 }
  0x1b   : > { %s291_s22 = sshll.u32 %s2522_s4, 4  ;;  %p2194_p7 = pneg %p2183_p6  ;;  %s2190_s22 = int_to_ptr.vmem [resolvable:$true] %s291_s22 }
  0x1d   : > { %p1826_p9 = pnand %p1824_p8, %p2194_p7 }
  0x1f   : > { %p1827_p10 = pneg %p1826_p9 }
  0x21   : > { %p1834_p0 = pnand %p1833_p13, %p1827_p10 }
  0x23   : > { %1837 = shalt.err (!%p1834_p0)
}
  0x24   : > { %s2524_s1 = sld [smem:[#allocation27_spill]]  ;;  %s2066_s14 = smov [#allocation11]  }
  0x25   : > { %s2525_s2 = sld [smem:[#allocation28_spill]]  ;;  %s1849_s20 = scalar_lea.vmem %s281_s18, 16 }
  0x26   : > { %p1850_p2 = scmp.ne.s32.totalorder %s281_s18, %s1849_s20  ;;  %p1857_p9 = scmp.lt.s32.totalorder %s281_s18, %s281_s18 }
  0x27   : > { %p1858_p10 = scmp.lt.s32.totalorder %s1849_s20, %s1849_s20 }
  0x28   : > { %p1852_p5 = pnand %p1850_p2, %p2194_p7 }
  0x29   : > { %p1859_p11 = por %p1858_p10, %p1857_p9 }
  0x2a   : > { %1674 = dma.hbm_to_vmem [thread:$0]  (!%p2183_p6), %s2524_s1, 32, %s261_s15, [#allocation10]  }
  0x2b   : > { %1677 = dma.hbm_to_smem (!%p2183_p6), %s2525_s2, 64, %s2066_s14, [#allocation7]  }
  0x2c   : > { %p1853_p8 = pneg %p1852_p5 }
  0x2e   : > { %p1860_p12 = pnand %p1859_p11, %p1853_p8 }
  0x30   : > { %1863 = shalt.err (!%p1860_p12)
}
  0x31   : > { %s2067_s21 = smov [#allocation12]   ;;  %s1864_s15 = scalar_lea.vmem %s2190_s22, 16 }
  0x32   : > { %1680 = dma.vmem_to_smem (!%p2183_p6), %s281_s18, 16, %s2067_s21, [#allocation8]  }
  0x33   : > { %p1865_p13 = scmp.ne.s32.totalorder %s2190_s22, %s1864_s15  ;;  %p1872_p2 = scmp.lt.s32.totalorder %s2190_s22, %s2190_s22 }
  0x34   : > { %p1873_p5 = scmp.lt.s32.totalorder %s1864_s15, %s1864_s15 }
  0x35   : > { %p1867_p0 = pnand %p1865_p13, %p2194_p7 }
  0x36   : > { %p1874_p3 = por %p1873_p5, %p1872_p2 }
  0x37   : > { %p1868_p4 = pneg %p1867_p0 }
  0x39   : > { %p1875_p9 = pnand %p1874_p3, %p1868_p4 }
  0x3b   : > { %1878 = shalt.err (!%p1875_p9)
}
  0x3c   : > { %s2068_s24 = smov [#allocation13]   ;;  %s2069_s25 = smov [#allocation15]  }
  0x3d   : > { %1683 = dma.vmem_to_smem (!%p2183_p6), %s2190_s22, 16, %s2068_s24, [#allocation14]  }
  0x3e   : > { %s304_s26 = sshll.u32 %s2069_s25, 4  ;;  %s305_s26 = int_to_ptr.vmem [resolvable:$true] %s304_s26 }
  0x3f   : > { %s1890_s18 = scalar_lea.vmem %s305_s26, 512  ;;  %p1898_p12 = scmp.lt.s32.totalorder %s305_s26, %s305_s26 }
  0x40   : > { %p1891_p8 = scmp.ne.s32.totalorder %s305_s26, %s1890_s18  ;;  %p1899_p13 = scmp.lt.s32.totalorder %s1890_s18, %s1890_s18 }
  0x42   : > { %p1893_p10 = pnand %p1891_p8, %p2194_p7  ;;  %p1900_p0 = por %p1899_p13, %p1898_p12 }
  0x44   : > { %p1894_p11 = pneg %p1893_p10 }
  0x46   : > { %p1901_p2 = pnand %p1900_p0, %p1894_p11 }
  0x48   : > { %1904 = shalt.err (!%p1901_p2)
}
  0x49   : > { %s2070_s14 = smov 128   ;;  %s2071_s16 = smov 8  }
  0x4a   : > { %s2526_s6 = sld [smem:[#allocation31_spill]]  ;;  %s2072_s20 = smov [#allocation16]  }
  0x4b   : > { %s317_s21 = sshll.u32 %s2072_s20, 4  ;;  %s318_s21 = int_to_ptr.vmem [resolvable:$true] %s317_s21 }
  0x4c   : > { %s1916_s15 = scalar_lea.vmem %s318_s21, 512  ;;  %p1924_p9 = scmp.lt.s32.totalorder %s318_s21, %s318_s21 }
  0x4d   : > { %p1917_p3 = scmp.ne.s32.totalorder %s318_s21, %s1916_s15  ;;  %p1925_p8 = scmp.lt.s32.totalorder %s1916_s15, %s1916_s15 }
  0x4f   : > { %p1919_p4 = pnand %p1917_p3, %p2194_p7  ;;  %p1926_p10 = por %p1925_p8, %p1924_p9 }
  0x50   : > { %1686 = dma.hbm_to_vmem [thread:$0]  (!%p2183_p6), %s2526_s6, 512, %s305_s26, [#allocation10], %s2070_s14, %s2070_s14, %s2071_s16  }
  0x51   : > { %p1920_p5 = pneg %p1919_p4 }
  0x53   : > { %p1927_p11 = pnand %p1926_p10, %p1920_p5 }
  0x55   : > { %1930 = shalt.err (!%p1927_p11)
}
  0x56   : > { %s2073_s24 = smov 64   ;;  %s2074_s23 = smov 4  }
  0x57   : > { %1689 = dma.hbm_to_vmem [thread:$0]  (!%p2183_p6), %s2509_s7, 512, %s318_s21, [#allocation17], %s2073_s24, %s2073_s24, %s2074_s23  }
  0x58   : > { %s1478_s18 = sadd.s32 4294967294, %s2063_s10   ;;  %s41_s14 = sadd.s32 1, %s2059_s9 }
  0x59   : > { %p43_p7 = scmp.ge.s32.totalorder %s41_s14, 2  ;;  %s48_s16 = sadd.s32 1, %s2051_s29 }
  0x5a   : > { %p55_p12 = scmp.ne.s32.totalorder %s2051_s29, %s2047_s28  ;;  %p56_p13 = scmp.eq.s32.totalorder %s2063_s10, 0 }
  0x5b   : > { %s2541_s14 = smov (%p43_p7, %s41_s14), 0  ;;  %p61_p2 = scmp.ne.s32.totalorder %s2047_s28, %s2043_s27 }
  0x5c   : > { %p2245_p0 = por %p56_p13, %p55_p12  ;;  %s45_s19 = ssub.s32 %s2059_s9, %s2541_s14 }
  0x5d   : > { %p234_p6 = scmp.eq.s32.totalorder %s1477_s11, 1  ;;  %p46_p3 = scmp.eq.s32.totalorder %s45_s19, 0 }
  0x5e   : > { %p2257_p4 = por %p2166_p1, %p61_p2  ;;  %p240_p9 = scmp.eq.s32.totalorder %s1478_s18, 1 }
  0x5f   : > { %p2261_p5 = por %p234_p6, %p55_p12  ;;  %p1704_p10 = scmp.lt.s32.totalorder %s2063_s10, 2 }
  0x60   : > { %s2266_s21 = scalar_select %p46_p3, %s2051_s29, %s48_s16  }
  0x61   : > { %p2268_p8 = por %p240_p9, %p61_p2  ;;  %s331_s24 = sand.u32 1, %s2051_s29  }
  0x62   : > { %s1488_s11 = sshll.u32 %s2059_s9, 7  ;;  %s1487_s23 = sshll.u32 %s331_s24, 3 }
  0x63   : > { %s340_s19 = scalar_lea.hbm %s2502_s0, %s1488_s11  ;;  %s335_s1 = scalar_lea.vmem [#allocation4], %s1487_s23 }
  0x64   : > { %s342_s2 = sshll.u32 %s335_s1, 4  ;;  %p2280_p11 = pnand %p1704_p10, %p2245_p0  ;;  %s343_s2 = int_to_ptr.vmem [resolvable:$true] %s342_s2 }
  0x65   : > { %s332_s18 = scalar_lea.sflag [#allocation5], %s331_s24  ;;  %s1944_s16 = scalar_lea.vmem %s343_s2, 128 }
  0x66   : > { %p1933_p7 = pneg %p2280_p11  ;;  %p1945_p12 = scmp.ne.s32.totalorder %s343_s2, %s1944_s16 }
  0x67   : > { %s2075_s4 = smov [#allocation4]  }
  0x68   : > { %p1947_p13 = pnand %p1945_p12, %p1933_p7  ;;  %s1949_s6 = sshll.u32 %s2075_s4, 4  ;;  %s1950_s6 = int_to_ptr.vmem [resolvable:$false] %s1949_s6 }
  0x69   : > { %s1951_s11 = scalar_lea.vmem %s1950_s6, 256  ;;  %p1952_p6 = scmp.lt.s32.totalorder %s343_s2, %s1950_s6 }
  0x6a   : > { %p1948_p2 = pneg %p1947_p13  ;;  %p1953_p3 = scmp.lt.s32.totalorder %s1951_s11, %s1944_s16 }
  0x6c   : > { %p1954_p9 = por %p1953_p3, %p1952_p6 }
  0x6e   : > { %p1955_p0 = pnand %p1954_p9, %p1948_p2 }
  0x70   : > { %1958 = shalt.err (!%p1955_p0)
}
  0x71   : > { %1693 = dma.hbm_to_vmem [thread:$0]  (!%p2280_p11), %s340_s19, 128, %s343_s2, %s332_s18  }
  0x72   : > { %p2532_p10 = scmp.ne.s32.totalorder %s2519_s13, 0 }
  0x73   : > { %s2291_s1 = sand.u32 (!%p2532_p10), 1, %s2047_s28  }
  0x74   : > { %351 = sbr.rel (%p2532_p10) target bundleno = 1562 (0x61a), region = 52  ;;  %s2512_s4 = sshll.u32 (!%p2532_p10), %s2291_s1, 3 }
  0x75   : > { %s354_s17 = scalar_lea.sflag (!%p2532_p10), [#allocation5], %s2291_s1  ;;  %s357_s6 = scalar_lea.vmem (!%p2532_p10), [#allocation4], %s2512_s4 }
  0x79   : > { %2010 = dma.done.wait (%p2257_p4), %s354_s17, 128  }
  0x7a   : > { %2012 = vsyncadd (%p2257_p4), %s354_s17, 4294967168 }
  0x7b   : > { %2014 = dma.done.wait (%p2166_p1), [#allocation10], 32  }
  0x7c   : > { %2016 = vsyncadd (%p2166_p1), [#allocation10], 4294967264 }
  0x7d   : > { %2018 = dma.done.wait (%p2166_p1), [#allocation7], 64  }
  0x7e   : > { %2020 = vsyncadd (%p2166_p1), [#allocation7], 4294967232 }
  0x7f   : > { %2022 = dma.done.wait (%p2166_p1), [#allocation8], 16  }
  0x80   : > { %2024 = vsyncadd (%p2166_p1), [#allocation8], 4294967280 }
  0x81   : > { %2026 = dma.done.wait (%p2166_p1), [#allocation14], 16  }
  0x82   : > { %2028 = vsyncadd (%p2166_p1), [#allocation14], 4294967280 }
  0x83   : > { %2030 = dma.done.wait (%p2166_p1), [#allocation10], 512  }
  0x84   : > { %2032 = vsyncadd (%p2166_p1), [#allocation10], 4294966784 }
  0x85   : > { %2034 = dma.done.wait (%p2166_p1), [#allocation17], 512  }
  0x86   : > { %2036 = vsyncadd (%p2166_p1), [#allocation17], 4294966784 }
  0x87   : > { %386 = sfence }
  0x88   : > { %v420_v0 = vld [vmem:[%s357_s6] sm:$0xff]  ;;  %vm421_vm0 = vcmask 261120   ;;  %v2076_v10 = vmov 0   ;;  %v1785_v11 = vld [vmem:[#allocation15] ss:$8 sps:$4 sm:$0xff]   ;;  %v2077_v19 = vmov 0.0   ;;  %v443_v20 = vlaneseq }
  0x89   : > { %v422_v1 = vsel %vm421_vm0, %v420_v0, 0.0  ;;  %v1780_v7 = vld [vmem:[#allocation15 + $0x14] ss:$8 sps:$4 sm:$0xff]   ;;  %v1782_v8 = vld [vmem:[#allocation15 + $0x10] ss:$8 sps:$4 sm:$0xff]   ;;  %508 = vmatprep.mubr.bf16.mxu0 %v2076_v10  ;;  %v1786_v18 = vld [vmem:[#allocation16] sm:$0xff]   ;;  %1571 = vmatprep.subr.bf16.mxu1 %v2077_v19 }
  0x8a   : > { %423 = vadd.xlane.f32.xlu0 %v422_v1  ;;  %v1783_v9 = vld [vmem:[#allocation15 + $0x4] ss:$8 sps:$4 sm:$0xff]   ;;  %488 = vmatprep.subr.bf16.mxu0 %v1780_v7  ;;  %vm2078_vm1 = vmmov 0   ;;  %v444_v21 = vshrl.u32 %v443_v20, 7  ;;  %v1790_v23 = vld [vmem:[#allocation16 + $0x10] sm:$0xff]   ;;  %vm528_vm2 = vcmask 130048  }
  0x8b   : > { %489 = vmatpush1.bf16.msra.mxu0 %v1782_v8  ;;  %1572 = vmatpush3.bf16.msra.mxu1 %v1786_v18  ;;  %v441_v24 = vld [vmem:[#allocation9] sm:$0x3]  ;;  %v1789_v34 = vld [vmem:[#allocation16 + $0x8] sm:$0xff]   ;;  %s2079_s2 = smov 112   ;;  %s2080_s3 = smov 96   ;;  %vm573_vm3 = vcmask 257024  }
  0x8c   : > { %490 = vmatprep.subr.bf16.mxu0 %v1783_v9  ;;  %1577 = vmatprep.subr.bf16.mxu1 %v2077_v19  ;;  %v445_v22 = vsub.s32 0, %v444_v21  ;;  %v449_v25 = vsub.s32 1, %v444_v21  ;;  %s2081_s12 = smov 64   ;;  %s2082_s13 = smov 80   ;;  %v1791_v40 = vld [vmem:[#allocation16 + $0x18] sm:$0xff]   ;;  %vm1104_vm4 = vcmask 1043456  }
  0x8d   : > { %1573 = vmatprep.mubr.msk.bf16.mxu1 %vm2078_vm1, %v2077_v19  ;;  %s2083_s22 = smov 48   ;;  %s2084_s24 = smov 32   ;;  %vm806_vm5 = vcmask 64512  }
  0x8e   : > { %v446_v26 = vrot.slane %v441_v24, %v445_v22  ;;  %v450_v27 = vrot.slane %v441_v24, %v449_v25  ;;  %s2085_s23 = smov 16   ;;  %s2386_s25 = sld [smem:[#allocation11]] }
  0x8f   : > { %491 = vmatpush1.bf16.msra.mxu0 %v1785_v11  ;;  %s2388_s26 = sld [smem:[#allocation11 + $0x1]] }
  0x90   : > { %1583 = vmatprep.subr.bf16.mxu0 %v2077_v19  ;;  %s2390_s19 = sld [smem:[#allocation11 + $0x2]] }
  0x91   : > { %s2392_s18 = sld [smem:[#allocation11 + $0x3]] }
  0x92   : > { %s1520_s16 = sld [smem:[#allocation11 + $0x80]] }
  0x93   : > { %s2394_s11 = sld [smem:[#allocation11 + $0x81]] }
  0x94   : > { %s2396_s17 = sld [smem:[#allocation11 + $0x82]] }
  0x95   : > { %s2398_s6 = sld [smem:[#allocation11 + $0x83]] }
  0x96   : > { %s2414_s4 = sld [smem:[#allocation11 + $0x183]] }
 0x113   : > { %v424_v2 = vpop.xlane.xlu0 %423 }
 0x114   : > { %v426_v3 = vmul.f32 0.03125, %v424_v2 }
 0x116   : > { %v427_v4 = vsub.f32 %v420_v0, %v426_v3 }
 0x118   : > { %v428_v5 = vmul.f32 %v427_v4, %v427_v4 }
 0x11a   : > { %v429_v6 = vsel %vm421_vm0, %v428_v5, 0.0 }
 0x11b   : > { %430 = vadd.xlane.f32.xlu0 %v429_v6 }
 0x1a4   : > { %v431_v12 = vpop.xlane.xlu0 %430 }
 0x1a5   : > { %v432_v13 = vmul.f32 0.03125, %v431_v12 }
 0x1a7   : > { %v433_v14 = vadd.f32 1e-05, %v432_v13 }
 0x1a9   : > { %1792 = vrsqrt.f32 %v433_v14 }
 0x1b6   : > { %v1793_v15 = vpop.eup %1792 }
 0x1b7   : > { %v435_v16 = vmul.f32 %v1793_v15, %v427_v4 }
 0x1b9   : > { %v436_v17 = vpack.c.bf16 %v435_v16, %v435_v16 }
 0x1bb   : > { %1502 = vmatmul.mubr.msk.bf16.vlgmr.msra.gmra.mxu0 %vm421_vm0, %v436_v17 }
 0x1bc   : > { %1585 = vmatprep.mubr.msk.bf16.mxu0 %vm2078_vm1, %v2077_v19  ;;  %1584 = vmatpush3.bf16.msra.mxu0 %v1790_v23 }
 0x1bd   : > { %1595 = vmatprep.subr.bf16.mxu0 %v2077_v19 }
 0x27b   : > { %v510_v28 = vpop.f32.mrf.mxu0 }
 0x27c   : > { %v511_v29 = vadd.f32 %v510_v28, %v446_v26 }
 0x27d   : > { %v512_v30 = vpop.f32.mrf.mxu0 }
 0x27e   : > { %v517_v31 = vpack.c.bf16 %v511_v29, %v511_v29  ;;  %v513_v32 = vadd.f32 %v512_v30, %v450_v27 }
 0x27f   : > { %v514_v33 = vpop.f32.mrf.mxu0 }
 0x280   : > { %518 = vst [vmem:[#allocation2] sm:$0xf] %v517_v31  ;;  %v519_v35 = vpack.c.bf16 %v513_v32, %v513_v32 }
 0x281   : > { %v515_v36 = vpop.f32.mrf.mxu0 }
 0x282   : > { %579 = vrot.lane.b32.xlu1 %v519_v35, %s2079_s2  ;;  %1574 = vmatmul.mubr.msk.bf16.vlgmr.msra.gmra.mxu1 %vm528_vm2, %v519_v35 }
 0x283   : > { %1578 = vmatpush3.bf16.msra.mxu1 %v1789_v34  ;;  %1579 = vmatprep.mubr.msk.bf16.mxu1 %vm2078_vm1, %v2077_v19 }
 0x284   : > { %1589 = vmatprep.subr.bf16.mxu1 %v2077_v19 }
 0x286   : > { %636 = vrot.lane.b32.xlu1 %v519_v35, %s2080_s3 }
 0x287   : > { %v1787_v37 = vld [vmem:[#allocation2] ss:$0 sps:$4 sm:$0xff]  }
 0x288   : > { %v752_v38 = vld [vmem:[#allocation2] sm:$0xf]  ;;  %757 = vrot.lane.b32.xlu0 %v1787_v37, %s2081_s12  ;;  %s2404_s12 = sld [smem:[#allocation11 + $0x102]] }
 0x289   : > { %v1513_v39 = vcombine.low %v752_v38, %v752_v38 }
 0x28a   : > { %693 = vrot.lane.b32.xlu1 %v519_v35, %s2082_s13 }
 0x28c   : > { %943 = vrot.lane.b32.xlu0 %v1513_v39, %s2082_s13  ;;  %s2406_s13 = sld [smem:[#allocation11 + $0x103]] }
 0x28e   : > { %823 = vrot.lane.b32.xlu1 %v1787_v37, %s2083_s22  ;;  %s2408_s22 = sld [smem:[#allocation11 + $0x180]] }
 0x292   : > { %884 = vrot.lane.b32.xlu1 %v1787_v37, %s2084_s24  ;;  %s2410_s24 = sld [smem:[#allocation11 + $0x181]] }
 0x296   : > { %821 = vrot.lane.b32.xlu1 %v1513_v39, %s2079_s2  ;;  %s2400_s2 = sld [smem:[#allocation11 + $0x100]] }
 0x29a   : > { %945 = vrot.lane.b32.xlu1 %v1787_v37, %s2085_s23  ;;  %s2412_s23 = sld [smem:[#allocation11 + $0x182]] }
 0x29e   : > { %882 = vrot.lane.b32.xlu1 %v1513_v39, %s2080_s3  ;;  %s2402_s3 = sld [smem:[#allocation11 + $0x101]] }
 0x2f4   : > { %v580_v41 = vpop.permute.xlu1 %579 }
 0x2f5   : > { %1580 = vmatmul.mubr.msk.bf16.vlgmr.msra.gmra.mxu1 %vm528_vm2, %v580_v41 }
 0x2f6   : > { %1590 = vmatpush3.bf16.msra.mxu1 %v1791_v40  ;;  %1591 = vmatprep.mubr.msk.bf16.mxu1 %vm2078_vm1, %v2077_v19 }
 0x2f7   : > { %1601 = vmatprep.subr.bf16.mxu1 %v2077_v19 }
 0x2f8   : > { %v637_v42 = vpop.permute.xlu1 %636 }
 0x2f9   : > { %1586 = vmatmul.mubr.msk.bf16.vlgmr.msra.gmra.mxu0 %vm528_vm2, %v637_v42 }
 0x2fa   : > { %1597 = vmatprep.mubr.msk.bf16.mxu0 %vm2078_vm1, %v2077_v19  ;;  %v758_v43 = vpop.permute.xlu0 %757 }
 0x2fb   : > { %v764_v45 = vsel %vm528_vm2, %v758_v43, 0 }
 0x2fc   : > { %v694_v44 = vpop.permute.xlu1 %693  ;;  %1596 = vmatpush3.bf16.xpose.msra.mxu0 %v764_v45 }
 0x2fd   : > { %1592 = vmatmul.mubr.msk.bf16.vlgmr.msra.gmra.mxu1 %vm528_vm2, %v694_v44  ;;  %1607 = vmatprep.subr.bf16.mxu0 %v2077_v19 }
 0x2fe   : > { %1603 = vmatprep.mubr.msk.bf16.mxu1 %vm2078_vm1, %v2077_v19  ;;  %v944_v54 = vpop.permute.xlu0 %943 }
 0x300   : > { %v824_v46 = vpop.permute.xlu1 %823 }
 0x301   : > { %v829_v47 = vsel %vm528_vm2, %v824_v46, 0 }
 0x302   : > { %1602 = vmatpush3.bf16.xpose.msra.mxu1 %v829_v47 }
 0x303   : > { %1613 = vmatprep.subr.bf16.mxu1 %v2077_v19  ;;  %1598 = vmatmul.mubr.msk.bf16.vlgmr.msra.gmra.mxu0 %vm528_vm2, %v752_v38 }
 0x304   : > { %v885_v48 = vpop.permute.xlu1 %884  ;;  %1609 = vmatprep.mubr.msk.bf16.mxu0 %vm2078_vm1, %v2077_v19 }
 0x305   : > { %v890_v49 = vsel %vm528_vm2, %v885_v48, 0 }
 0x306   : > { %1608 = vmatpush3.bf16.xpose.msra.mxu0 %v890_v49 }
 0x307   : > { %1619 = vmatprep.subr.bf16.mxu0 %v2077_v19 }
 0x308   : > { %v822_v50 = vpop.permute.xlu1 %821 }
 0x309   : > { %1604 = vmatmul.mubr.msk.bf16.vlgmr.msra.gmra.mxu1 %vm528_vm2, %v822_v50 }
 0x30a   : > { %1615 = vmatprep.mubr.msk.bf16.mxu1 %vm2078_vm1, %v2077_v19 }
 0x30c   : > { %v946_v51 = vpop.permute.xlu1 %945 }
 0x30d   : > { %v951_v52 = vsel %vm528_vm2, %v946_v51, 0 }
 0x30e   : > { %1614 = vmatpush3.bf16.xpose.msra.mxu1 %v951_v52 }
 0x30f   : > { %1625 = vmatprep.subr.bf16.mxu1 %v2077_v19 }
 0x310   : > { %v883_v53 = vpop.permute.xlu1 %882 }
 0x311   : > { %1610 = vmatmul.mubr.msk.bf16.vlgmr.msra.gmra.mxu0 %vm528_vm2, %v883_v53 }
 0x312   : > { %1621 = vmatprep.mubr.msk.bf16.mxu0 %vm2078_vm1, %v2077_v19 }
 0x315   : > { %1616 = vmatmul.mubr.msk.bf16.vlgmr.msra.gmra.mxu1 %vm528_vm2, %v944_v54 }
 0x316   : > { %1627 = vmatprep.mubr.msk.bf16.mxu1 %vm2078_vm1, %v2077_v19 }
 0x342   : > { %v566_v55 = vpop.f32.mrf.mxu1 }
 0x343   : > { %v572_v56 = vpack.c.bf16 %v566_v55, %v566_v55 }
 0x344   : > { %v1575_v57 = vpop.f32.mrf.mxu1 }
 0x345   : > { %574 = vst.msk [vmem:[#allocation3] sm:$0xf] %vm573_vm3, %v572_v56 }
 0x346   : > { %v569_v58 = vpop.f32.mrf.mxu1 }
 0x348   : > { %v1576_v59 = vpop.f32.mrf.mxu1 }
 0x34c   : > { %v1090_v60 = vld [vmem:[#allocation3] sm:$0xf] }
 0x34d   : > { %v1152_v61 = vsel %vm1104_vm4, %v1090_v60, 0 }
 0x34e   : > { %1626 = vmatpush3.bf16.msra.mxu1 %v1152_v61 }
 0x34f   : > { %1637 = vmatprep.subr.bf16.mxu1 %v2077_v19 }
 0x3b5   : > { %v624_v62 = vpop.f32.mrf.mxu1 }
 0x3b6   : > { %v630_v63 = vpack.c.bf16 %v624_v62, %v624_v62 }
 0x3b7   : > { %v1581_v0 = vpop.f32.mrf.mxu1 }
 0x3b8   : > { %632 = vst.msk [vmem:[#allocation3 + $0x4] sm:$0xf] %vm573_vm3, %v630_v63  ;;  %v1022_v63 = vstv %s1520_s16  ;;  %s1539_s16 = sld [smem:[#allocation12 + $0x3]] }
 0x3b9   : > { %v627_v1 = vpop.f32.mrf.mxu1  ;;  %v681_v2 = vpop.f32.mrf.mxu0 }
 0x3ba   : > { %v687_v3 = vpack.c.bf16 %v681_v2, %v681_v2  ;;  %v1033_v1 = vstv %s2394_s11  ;;  %v1020_v2 = vstv %s2386_s25  ;;  %s1083_s25 = sld [smem:[#allocation12]] }
 0x3bb   : > { %v1582_v4 = vpop.f32.mrf.mxu1  ;;  %v1587_v5 = vpop.f32.mrf.mxu0  ;;  %s2431_s11 = sld [smem:[#allocation13 + $0x2]] }
 0x3bc   : > { %689 = vst.msk [vmem:[#allocation3 + $0x8] sm:$0xf] %vm573_vm3, %v687_v3  ;;  %v1031_v3 = vstv %s2388_s26  ;;  %v1043_v4 = vstv %s2390_s19  ;;  %v1045_v5 = vstv %s2396_s17  ;;  %s1533_s26 = sld [smem:[#allocation13 + $0x1]] }
 0x3bd   : > { %v684_v6 = vpop.f32.mrf.mxu0  ;;  %v738_v7 = vpop.f32.mrf.mxu1  ;;  %s1086_s19 = sld [smem:[#allocation13]] }
 0x3be   : > { %v744_v8 = vpack.c.bf16 %v738_v7, %v738_v7  ;;  %v1055_v7 = vstv %s2392_s18  ;;  %s1536_s18 = sld [smem:[#allocation12 + $0x2]] }
 0x3bf   : > { %v1588_v9 = vpop.f32.mrf.mxu0  ;;  %v1593_v10 = vpop.f32.mrf.mxu1  ;;  %v1100_v11 = vld [vmem:[#allocation3 + $0x4] sm:$0xf]  ;;  %s1540_s17 = sld [smem:[#allocation13 + $0x3]] }
 0x3c0   : > { %746 = vst.msk [vmem:[#allocation3 + $0xc] sm:$0xf] %vm573_vm3, %v744_v8  ;;  %v1106_v12 = vsel %vm1104_vm4, %v1100_v11, 0  ;;  %v1025_v9 = vstv %s2400_s2  ;;  %v1036_v10 = vstv %s2402_s3  ;;  %v1057_v11 = vstv %s2398_s6  ;;  %s1544_s3 = sshll.u32 %s2055_s30, 7  ;;  %s1319_s30 = scalar_lea.sflag [#allocation6], %s2291_s1 }
 0x3c1   : > { %v741_v13 = vpop.f32.mrf.mxu1  ;;  %1620 = vmatpush3.bf16.msra.mxu0 %v1106_v12 }
 0x3c2   : > { %1631 = vmatprep.subr.bf16.mxu0 %v2077_v19  ;;  %v1048_v13 = vstv %s2404_s12  ;;  %s2533_s12 = sshll.u32 %s2291_s1, 3 }
 0x3c3   : > { %v1594_v14 = vpop.f32.mrf.mxu1  ;;  %v800_v15 = vpop.f32.mrf.mxu0 }
 0x3c4   : > { %v807_v16 = vsel %vm806_vm5, %v800_v15, -inf }
 0x3c5   : > { %808 = vmax.xlane.f32.xlu1 %v807_v16  ;;  %v1599_v17 = vpop.f32.mrf.mxu0 }
 0x3c6   : > { %v1060_v17 = vstv %s2406_s13  ;;  %s414_s13 = scalar_lea.vmem [#allocation18], %s2533_s12 }
 0x3c7   : > { %v803_v18 = vpop.f32.mrf.mxu0 }
 0x3c8   : > { %v1028_v18 = vstv %s2408_s22  ;;  %s1333_s22 = sshll.u32 %s414_s13, 4  ;;  %s2455_s22 = int_to_ptr.vmem [resolvable:$true] %s1333_s22 }
 0x3c9   : > { %v865_v20 = vpop.f32.mrf.mxu1  ;;  %v1600_v22 = vpop.f32.mrf.mxu0 }
 0x3ca   : > { %v871_v21 = vsel %vm806_vm5, %v865_v20, -inf }
 0x3cb   : > { %872 = vmax.xlane.f32.xlu0 %v871_v21  ;;  %v1605_v23 = vpop.f32.mrf.mxu1 }
 0x3cc   : > { %v1039_v23 = vstv %s2410_s24 }
 0x3cd   : > { %v868_v24 = vpop.f32.mrf.mxu1 }
 0x3cf   : > { %v1606_v25 = vpop.f32.mrf.mxu1 }
 0x3d1   : > { %v926_v26 = vpop.f32.mrf.mxu0 }
 0x3d2   : > { %v932_v27 = vsel %vm806_vm5, %v926_v26, -inf }
 0x3d3   : > { %933 = vmax.xlane.f32.xlu0 %v932_v27  ;;  %v1611_v28 = vpop.f32.mrf.mxu0 }
 0x3d4   : > { %v1051_v28 = vstv %s2412_s23 }
 0x3d5   : > { %v929_v29 = vpop.f32.mrf.mxu0  ;;  %v987_v30 = vpop.f32.mrf.mxu1 }
 0x3d6   : > { %v993_v31 = vsel %vm806_vm5, %v987_v30, -inf }
 0x3d7   : > { %v1617_v32 = vpop.f32.mrf.mxu1  ;;  %994 = vmax.xlane.f32.xlu1 %v993_v31  ;;  %v1612_v33 = vpop.f32.mrf.mxu0 }
 0x3d9   : > { %v990_v34 = vpop.f32.mrf.mxu1 }
 0x3db   : > { %v1618_v35 = vpop.f32.mrf.mxu1 }
 0x44e   : > { %v809_v36 = vpop.xlane.xlu1 %808 }
 0x44f   : > { %v810_v37 = vsub.f32 %v800_v15, %v809_v36 }
 0x451   : > { %v811_v38 = vmul.f32 1.442695, %v810_v37 }
 0x453   : > { %1794 = vpow2.f32 %v811_v38 }
 0x454   : > { %v873_v39 = vpop.xlane.xlu0 %872 }
 0x455   : > { %v874_v40 = vsub.f32 %v865_v20, %v873_v39 }
 0x457   : > { %v875_v41 = vmul.f32 1.442695, %v874_v40 }
 0x459   : > { %1796 = vpow2.f32 %v875_v41 }
 0x45c   : > { %v934_v42 = vpop.xlane.xlu0 %933 }
 0x45d   : > { %v935_v43 = vsub.f32 %v926_v26, %v934_v42 }
 0x45f   : > { %v936_v44 = vmul.f32 1.442695, %v935_v43 }
 0x460   : > { %v995_v45 = vpop.xlane.xlu1 %994  ;;  %v1795_v46 = vpop.eup %1794 }
 0x461   : > { %1798 = vpow2.f32 %v936_v44  ;;  %v996_v47 = vsub.f32 %v987_v30, %v995_v45  ;;  %v813_v48 = vsel %vm806_vm5, %v1795_v46, 0.0  ;;  %v1063_v30 = vstv %s2414_s4  ;;  %s1532_s4 = sld [smem:[#allocation12 + $0x1]] }
 0x462   : > { %814 = vadd.xlane.f32.xlu0 %v813_v48 }
 0x463   : > { %v997_v49 = vmul.f32 1.442695, %v996_v47 }
 0x465   : > { %1800 = vpow2.f32 %v997_v49 }
 0x466   : > { %v1797_v50 = vpop.eup %1796 }
 0x467   : > { %v877_v51 = vsel %vm806_vm5, %v1797_v50, 0.0 }
 0x468   : > { %878 = vadd.xlane.f32.xlu1 %v877_v51 }
 0x46e   : > { %v1799_v52 = vpop.eup %1798 }
 0x46f   : > { %v938_v53 = vsel %vm806_vm5, %v1799_v52, 0.0 }
 0x470   : > { %939 = vadd.xlane.f32.xlu0 %v938_v53 }
 0x472   : > { %v1801_v54 = vpop.eup %1800 }
 0x473   : > { %v999_v55 = vsel %vm806_vm5, %v1801_v54, 0.0 }
 0x474   : > { %1000 = vadd.xlane.f32.xlu1 %v999_v55 }
 0x4eb   : > { %v815_v57 = vpop.xlane.xlu0 %814 }
 0x4f1   : > { %v879_v56 = vpop.xlane.xlu1 %878 }
 0x4f2   : > { %1802 = vrcp.f32 %v879_v56 }
 0x4f3   : > { %1804 = vrcp.f32 %v815_v57 }
 0x4f9   : > { %v940_v58 = vpop.xlane.xlu0 %939 }
 0x4fa   : > { %1806 = vrcp.f32 %v940_v58 }
 0x4fd   : > { %v1001_v59 = vpop.xlane.xlu1 %1000 }
 0x4fe   : > { %1808 = vrcp.f32 %v1001_v59 }
 0x4ff   : > { %v1803_v60 = vpop.eup %1802 }
 0x500   : > { %v1805_v61 = vpop.eup %1804  ;;  %v881_v62 = vmul.f32 %v1803_v60, %v1797_v50 }
 0x501   : > { %v817_v0 = vmul.f32 %v1805_v61, %v1795_v46 }
 0x502   : > { %v1023_v8 = vmul.f32 %v1022_v63, %v881_v62  ;;  %v1034_v12 = vmul.f32 %v1033_v1, %v881_v62  ;;  %v1046_v16 = vmul.f32 %v1045_v5, %v881_v62  ;;  %v1058_v27 = vmul.f32 %v1057_v11, %v881_v62 }
 0x503   : > { %v1021_v15 = vmul.f32 %v1020_v2, %v817_v0  ;;  %v1032_v20 = vmul.f32 %v1031_v3, %v817_v0  ;;  %v1044_v25 = vmul.f32 %v1043_v4, %v817_v0  ;;  %v1056_v33 = vmul.f32 %v1055_v7, %v817_v0 }
 0x504   : > { %v1093_v3 = vstv %s1532_s4  ;;  %v1084_v4 = vstv %s1083_s25  ;;  %v1096_v7 = vstv %s1533_s26  ;;  %s2453_s4 = scalar_lea.hbm %s2510_s8, %s1544_s3  ;;  %s1959_s25 = scalar_lea.vmem %s2455_s22, 128 }
 0x505   : > { %v1024_v26 = vadd.f32 %v1023_v8, %v1021_v15  ;;  %v1035_v32 = vadd.f32 %v1034_v12, %v1032_v20  ;;  %v1047_v34 = vadd.f32 %v1046_v16, %v1044_v25  ;;  %v1059_v41 = vadd.f32 %v1058_v27, %v1056_v33  ;;  %p1960_p1 = scmp.ne.s32.totalorder %s2455_s22, %s1959_s25  ;;  %s2086_s26 = smov [#allocation18]  }
 0x506   : > { %v1087_v8 = vstv %s1086_s19  ;;  %v1256_v25 = vstv %s1540_s17  ;;  %s1963_s19 = sshll.u32 %s2086_s26, 4  ;;  %s1964_s19 = int_to_ptr.vmem [resolvable:$false] %s1963_s19 }
 0x507   : > { %v1807_v6 = vpop.eup %1806  ;;  %p1961_p4 = pnand %p1960_p1, %p2261_p5  ;;  %p1966_p7 = scmp.lt.s32.totalorder %s2455_s22, %s1964_s19 }
 0x508   : > { %v942_v14 = vmul.f32 %v1807_v6, %v1799_v52 }
 0x509   : > { %p1962_p11 = pneg %p1961_p4 }
 0x50a   : > { %v1026_v21 = vmul.f32 %v1025_v9, %v942_v14  ;;  %v1037_v22 = vmul.f32 %v1036_v10, %v942_v14  ;;  %v1049_v29 = vmul.f32 %v1048_v13, %v942_v14  ;;  %v1061_v36 = vmul.f32 %v1060_v17, %v942_v14  ;;  %v1203_v17 = vld [vmem:[#allocation3 + $0x8] sm:$0xf] }
 0x50b   : > { %v1809_v24 = vpop.eup %1808  ;;  %v1196_v13 = vstv %s1536_s18  ;;  %v1253_v14 = vstv %s1539_s16  ;;  %s1965_s18 = scalar_lea.vmem %s1964_s19, 256 }
 0x50c   : > { %v1003_v31 = vmul.f32 %v1809_v24, %v1801_v54  ;;  %v1027_v35 = vadd.f32 %v1026_v21, %v1024_v26  ;;  %v1038_v40 = vadd.f32 %v1037_v22, %v1035_v32  ;;  %v1050_v42 = vadd.f32 %v1049_v29, %v1047_v34  ;;  %p1967_p12 = scmp.lt.s32.totalorder %s1965_s18, %s1959_s25 }
 0x50d   : > { %v1062_v46 = vadd.f32 %v1061_v36, %v1059_v41  ;;  %v1199_v24 = vstv %s2431_s11  ;;  %v1208_v26 = vsel %vm1104_vm4, %v1203_v17, 0 }
 0x50e   : > { %v1029_v37 = vmul.f32 %v1028_v18, %v1003_v31  ;;  %v1040_v38 = vmul.f32 %v1039_v23, %v1003_v31  ;;  %v1052_v39 = vmul.f32 %v1051_v28, %v1003_v31  ;;  %v1064_v44 = vmul.f32 %v1063_v30, %v1003_v31  ;;  %v1260_v18 = vld [vmem:[#allocation3 + $0xc] sm:$0xf]  ;;  %p1968_p13 = por %p1967_p12, %p1966_p7 }
 0x50f   : > { %v1265_v27 = vsel %vm1104_vm4, %v1260_v18, 0 }
 0x510   : > { %v1030_v43 = vadd.f32 %v1029_v37, %v1027_v35  ;;  %v1041_v45 = vadd.f32 %v1040_v38, %v1038_v40  ;;  %v1053_v47 = vadd.f32 %v1052_v39, %v1050_v42  ;;  %v1065_v49 = vadd.f32 %v1064_v44, %v1062_v46  ;;  %p1969_p2 = pnand %p1968_p13, %p1962_p11 }
 0x512   : > { %v1042_v48 = vadd.f32 %v1041_v45, %v1030_v43 }
 0x514   : > { %v1054_v50 = vadd.f32 %v1053_v47, %v1042_v48 }
 0x516   : > { %v1066_v51 = vadd.f32 %v1065_v49, %v1054_v50 }
 0x518   : > { %v1067_v52 = vmul.f32 0.25, %v1066_v51 }
 0x51a   : > { %v1068_v53 = vsub.f32 %v1030_v43, %v1067_v52  ;;  %v1070_v54 = vsub.f32 %v1041_v45, %v1067_v52  ;;  %v1073_v55 = vsub.f32 %v1053_v47, %v1067_v52  ;;  %v1076_v58 = vsub.f32 %v1065_v49, %v1067_v52  ;;  %v1542_v43 = vld [vmem:[%s2507_s5] ss:$0 sm:$0xff] }
 0x51c   : > { %v1069_v56 = vmul.f32 %v1068_v53, %v1068_v53  ;;  %v1071_v57 = vmul.f32 %v1070_v54, %v1070_v54  ;;  %v1074_v60 = vmul.f32 %v1073_v55, %v1073_v55  ;;  %v1077_v62 = vmul.f32 %v1076_v58, %v1076_v58 }
 0x51e   : > { %v1072_v59 = vadd.f32 %v1071_v57, %v1069_v56 }
 0x520   : > { %v1075_v61 = vadd.f32 %v1074_v60, %v1072_v59 }
 0x522   : > { %v1078_v63 = vadd.f32 %v1077_v62, %v1075_v61 }
 0x524   : > { %v1079_v0 = vmul.f32 0.25, %v1078_v63 }
 0x526   : > { %v1080_v1 = vadd.f32 1e-05, %v1079_v0 }
 0x528   : > { %1810 = vrsqrt.f32 %v1080_v1 }
 0x535   : > { %v1811_v2 = vpop.eup %1810 }
 0x536   : > { %v1091_v5 = vmul.f32 %v1811_v2, %v1070_v54  ;;  %v1082_v6 = vmul.f32 %v1811_v2, %v1068_v53  ;;  %v1194_v11 = vmul.f32 %v1811_v2, %v1073_v55  ;;  %v1251_v12 = vmul.f32 %v1811_v2, %v1076_v58 }
 0x538   : > { %v1094_v9 = vmul.f32 %v1093_v3, %v1091_v5  ;;  %v1085_v10 = vmul.f32 %v1084_v4, %v1082_v6  ;;  %v1197_v22 = vmul.f32 %v1196_v13, %v1194_v11  ;;  %v1254_v23 = vmul.f32 %v1253_v14, %v1251_v12 }
 0x53a   : > { %v1097_v15 = vadd.f32 %v1096_v7, %v1094_v9  ;;  %v1088_v16 = vadd.f32 %v1087_v8, %v1085_v10  ;;  %v1200_v28 = vadd.f32 %v1199_v24, %v1197_v22  ;;  %v1257_v29 = vadd.f32 %v1256_v25, %v1254_v23 }
 0x53c   : > { %v1098_v20 = vpack.c.bf16 %v1097_v15, %v1097_v15  ;;  %v1089_v21 = vpack.c.bf16 %v1088_v16, %v1088_v16  ;;  %v1201_v30 = vpack.c.bf16 %v1200_v28, %v1200_v28  ;;  %v1258_v31 = vpack.c.bf16 %v1257_v29, %v1257_v29 }
 0x53e   : > { %1622 = vmatmul.mubr.msk.bf16.vlgmr.msra.gmra.mxu0 %vm806_vm5, %v1098_v20  ;;  %1628 = vmatmul.mubr.msk.bf16.vlgmr.msra.gmra.mxu1 %vm806_vm5, %v1089_v21 }
 0x53f   : > { %1632 = vmatpush3.bf16.msra.mxu0 %v1208_v26  ;;  %1638 = vmatpush3.bf16.msra.mxu1 %v1265_v27 }
 0x540   : > { %1633 = vmatprep.mubr.msk.bf16.mxu0 %vm2078_vm1, %v2077_v19  ;;  %1639 = vmatprep.mubr.msk.bf16.mxu1 %vm2078_vm1, %v2077_v19 }
 0x546   : > { %1634 = vmatmul.mubr.msk.bf16.vlgmr.msra.gmra.mxu0 %vm806_vm5, %v1201_v30  ;;  %1640 = vmatmul.mubr.msk.bf16.vlgmr.msra.gmra.mxu1 %vm806_vm5, %v1258_v31 }
 0x5fe   : > { %v1142_v32 = vpop.f32.mrf.mxu0  ;;  %v1188_v33 = vpop.f32.mrf.mxu1 }
 0x5ff   : > { %v1189_v40 = vadd.f32 %v1188_v33, %v1142_v32 }
 0x600   : > { %v1623_v34 = vpop.f32.mrf.mxu0  ;;  %v1629_v35 = vpop.f32.mrf.mxu1 }
 0x602   : > { %v1145_v36 = vpop.f32.mrf.mxu0  ;;  %v1191_v37 = vpop.f32.mrf.mxu1 }
 0x604   : > { %v1624_v38 = vpop.f32.mrf.mxu0  ;;  %v1630_v39 = vpop.f32.mrf.mxu1 }
 0x606   : > { %v1244_v19 = vpop.f32.mrf.mxu0  ;;  %v1301_v41 = vpop.f32.mrf.mxu1 }
 0x607   : > { %v1250_v42 = vadd.f32 %v1244_v19, %v1189_v40 }
 0x608   : > { %v1635_v44 = vpop.f32.mrf.mxu0  ;;  %v1641_v45 = vpop.f32.mrf.mxu1 }
 0x609   : > { %v1307_v46 = vadd.f32 %v1301_v41, %v1250_v42 }
 0x60a   : > { %v1247_v47 = vpop.f32.mrf.mxu0  ;;  %v1304_v48 = vpop.f32.mrf.mxu1 }
 0x60b   : > { %v1315_v49 = vadd.f32 %v1542_v43, %v1307_v46 }
 0x60c   : > { %v1636_v50 = vpop.f32.mrf.mxu0  ;;  %v1642_v51 = vpop.f32.mrf.mxu1 }
 0x60d   : > { %1317 = vst.msk [vmem:[%s414_s13] sm:$0xff] %vm421_vm0, %v1315_v49 }
 0x60e   : > { %1972 = shalt.err (!%p1969_p2)
}
 0x60f   : > { %s1973_s16 = scalar_lea.hbm %s2453_s4, 128  ;;  %s1977_s17 = scalar_lea.hbm %s2510_s8, 256 }
 0x610   : > { %p1974_p6 = scmp.ne.s32.totalorder %s2453_s4, %s1973_s16  ;;  %p1978_p0 = scmp.lt.s32.totalorder %s2453_s4, %s2510_s8 }
 0x611   : > { %p1979_p10 = scmp.lt.s32.totalorder %s1977_s17, %s1973_s16 }
 0x612   : > { %p1975_p3 = pnand %p1974_p6, %p2261_p5 }
 0x613   : > { %p1980_p1 = por %p1979_p10, %p1978_p0 }
 0x614   : > { %p1976_p9 = pneg %p1975_p3 }
 0x616   : > { %p1981_p4 = pnand %p1980_p1, %p1976_p9 }
 0x618   : > { %1984 = shalt.err (!%p1981_p4)
}
 0x619   : > { %1669 = dma.vmem_to_hbm [thread:$0]  (%p2261_p5), %s2455_s22, 128, %s2453_s4, %s1319_s30  }
 0x61a PF: > { %s1345_s3 = sand.u32 1, %s2043_s27   ;;  %p2534_p11 = scmp.ge.s32.totalorder %s2063_s10, 2 }
 0x61b   : > { %s1346_s12 = scalar_lea.sflag [#allocation6], %s1345_s3 }
 0x61c   : > { %p1695_p7 = pnand %p2534_p11, %p2268_p8 }
 0x61e   : > { %p1696_p12 = pneg %p1695_p7 }
 0x620   : > { %2038 = dma.done.wait (%p1696_p12), %s1346_s12, 128  }
 0x621   : > { %2040 = vsyncadd (%p1696_p12), %s1346_s12, 4294967168  ;;  %s29_s10 = sadd.s32 1, %s2063_s10   ;;  %s2535_s27 = smov %s2047_s28 }
 0x622   : > { %p26_p13 = scmp.ge.s32.totalorder %s29_s10, 4   ;;  %s2536_s28 = smov %s2051_s29 }
 0x623   : > { %s2537_s29 = smov %s2266_s21  ;;  %s2538_s30 = smov %s2059_s9 }
 0x624   : > { %s2539_s9 = smov %s2541_s14  ;;  %28 = sbr.rel (!%p26_p13) target bundleno = 17 (0x11), region = 137 }
 0x629   :  { %1351 = vsyncpa [#allocation5], 1 }
 0x62a   :  { %1353 = vsyncpa [#allocation5 + $0x1], 1 }
 0x62b   :  { %1354 = vsyncpa [#allocation10], 1 }
 0x62c   :  { %1355 = vsyncpa [#allocation17], 1 }
 0x62d   :  { %1356 = vsyncpa [#allocation6], 1 }
 0x62e   :  { %1358 = vsyncpa [#allocation6 + $0x1], 1 }
 0x62f   :  { %1359 = vsyncpa [#allocation7], 1 }
 0x630   :  { %1361 = vsyncpa [#allocation7 + $0x1], 1 }
 0x631   :  { %1362 = vsyncpa [#allocation8], 1 }
 0x632   :  { %1364 = vsyncpa [#allocation8 + $0x1], 1 }
 0x633   :  { %1365 = vsyncpa [#allocation14], 1 }

</bundles_post_ra>
